<compile_context>
chip_gen: v7x
topology: tpu7x:2x2x1
jax: 0.10.0
libtpu: 0.0.40
codegen_flags: <defaults>
</compile_context>

<pallas_src>
import functools

import jax
import jax.numpy as jnp
from jax.experimental import pallas as pl
from jax.experimental.pallas import tpu as pltpu


# ----------------------------------------------------------------------------
# Fused kernel: grouped conv (VPU) + ReLU + node-mean + folded linear + MLP-2.
# ----------------------------------------------------------------------------
def _basenet_kernel(x_ref, kw_ref, kb_ref, wf_ref, bf_ref, w2_ref, b2_ref, o_ref,
                    *, n_nodes: int, seg_len: int, window: int, channels: int):
    N, L, Wk, Cc = n_nodes, seg_len, window, channels

    # x_ref block: (bB, Wk, N*L) f32.  x_ref[:, w, :] is the w-th in-window sample of
    # every (node, window) pair, node-major along lanes (column index = n*L + l).
    xw = [x_ref[:, w, :] for w in range(Wk)]                   # Wk x (bB, N*L)

    pooled_parts = []
    for c in range(Cc):
        # Grouped Conv1d(1, Cc, Wk, stride=Wk), channel c: VPU mul-add with SMEM
        # scalar weights (kw layout [w*Cc + c]); no block-diagonal weight, no MXU.
        acc = xw[0] * kw_ref[c]
        for w in range(1, Wk):
            acc = acc + xw[w] * kw_ref[w * Cc + c]
        acc = jnp.maximum(acc + kb_ref[c], 0.0)                # ReLU, (bB, N*L) f32

        # Mean over nodes (x.mean(dim=1)).  Pooling BEFORE the folded linear layers
        # is exact: everything between this ReLU and the MLP ReLU is linear.
        node_sum = acc[:, 0:L]
        for n in range(1, N):
            node_sum = node_sum + acc[:, n * L:(n + 1) * L]
        pooled_parts.append(node_sum * (1.0 / N))              # (bB, L)

    # Channel-major feature order (c*L + l) == PyTorch Flatten of the (Cc, L) conv map.
    pooled = jnp.concatenate(pooled_parts, axis=1)             # (bB, Cc*L) f32

    cdt = wf_ref.dtype                                         # bf16 MXU inputs
    h1 = jnp.dot(pooled.astype(cdt), wf_ref[...],
                 preferred_element_type=jnp.float32) + bf_ref[...]
    h1 = jnp.maximum(h1, 0.0)                                  # f32 VPU (v5e-safe)
    y = jnp.dot(h1.astype(cdt), w2_ref[...],
                preferred_element_type=jnp.float32) + b2_ref[...]
    o_ref[...] = y.astype(o_ref.dtype)                         # lane-dense (bB, 128k) store


# ----------------------------------------------------------------------------
# Batch-block choice: sublane-aligned, bounded VMEM tile, >= 2 grid steps.
# ----------------------------------------------------------------------------
def _choose_batch_block(batch: int, floats_per_batch: int) -> tuple[int, int]:
    """Returns (block_b, padded_batch)."""
    budget_rows = max(1, (256 * 1024) // max(4 * floats_per_batch, 1))   # ~256 KiB x tile
    bb = min(128, budget_rows, max(1, -(-batch // 2)))                   # <= half the batch
    bb = max(8, (bb // 8) * 8)                                           # sublane-aligned
    n_blocks = max(2, -(-batch // bb))                                   # >=2 (v7x megacore)
    return bb, bb * n_blocks


# ----------------------------------------------------------------------------
# Forward wrapper: JAX glue is layout plumbing only; all math runs in the kernel.
# ----------------------------------------------------------------------------
def basenet_forward(x, params, cfg):
    B, N, T = x.shape
    Wk = cfg["enc_window_size"]
    Cc = cfg["enc_channels"]
    C = cfg["mlp_class_num"]
    L = T // Wk
    NL = N * L

    # Conv1d(stride=Wk, no padding) drops trailing samples; put the (small) window axis
    # second-minor so the kernel contracts it on the VPU over lane-dense N*L columns.
    # This transpose is one cheap XLA layout op in HBM (plumbing, not hoisted compute).
    xw = (x[..., :L * Wk].reshape(B, N, L, Wk)
          .transpose(0, 3, 1, 2).reshape(B, Wk, NL))

    bB, Bp = _choose_batch_block(B, Wk * NL)
    if Bp != B:
        xw = jnp.pad(xw, ((0, Bp - B), (0, 0), (0, 0)))        # padded rows sliced off below
    grid = (Bp // bB,)

    kw, kb = params["kw"], params["kb"]
    wf, bf, w2, b2 = params["wf"], params["bf"], params["w2"], params["b2"]
    Kf, Ph = wf.shape
    Pc2 = w2.shape[1]
    assert Kf == Cc * L and w2.shape[0] == Ph

    cost = pl.CostEstimate(
        flops=2 * Bp * (N * L * Wk * Cc + Kf * Ph + Ph * Pc2),
        transcendentals=0,
        bytes_accessed=int(xw.size * xw.dtype.itemsize
                           + sum(int(p.size) * p.dtype.itemsize
                                 for p in (kw, kb, wf, bf, w2, b2))
                           + Bp * Pc2 * 4),
    )

    out = pl.pallas_call(
        functools.partial(_basenet_kernel,
                          n_nodes=N, seg_len=L, window=Wk, channels=Cc),
        out_shape=jax.ShapeDtypeStruct((Bp, Pc2), jnp.float32),
        grid=grid,
        in_specs=[
            pl.BlockSpec((bB, Wk, NL), lambda i: (i, 0, 0)),             # x windows
            pl.BlockSpec(memory_space=pltpu.MemorySpace.SMEM),           # conv kernel (Wk*Cc,)
            pl.BlockSpec(memory_space=pltpu.MemorySpace.SMEM),           # conv bias (Cc,)
            pl.BlockSpec((Kf, Ph), lambda i: (0, 0),
                         pipeline_mode=pl.Buffered(1)),                  # folded Wrep@W1
            pl.BlockSpec((1, Ph), lambda i: (0, 0),
                         pipeline_mode=pl.Buffered(1)),
            pl.BlockSpec((Ph, Pc2), lambda i: (0, 0),
                         pipeline_mode=pl.Buffered(1)),                  # MLP layer 2
            pl.BlockSpec((1, Pc2), lambda i: (0, 0),
                         pipeline_mode=pl.Buffered(1)),
        ],
        out_specs=pl.BlockSpec((bB, Pc2), lambda i: (i, 0)),
        compiler_params=pltpu.CompilerParams(
            dimension_semantics=("parallel",),            # batch blocks across TCs (v7x)
            vmem_limit_bytes=32 * 1024 * 1024),
        cost_estimate=cost,
    )(xw, kw, kb, wf, bf, w2, b2)

    return out[:B, :C]                                    # drop batch + 128-lane padding


# ----------------------------------------------------------------------------
# Parameters: raw f32 (PyTorch-layout) weights + offline fold / 128-lane padding.
# ----------------------------------------------------------------------------
def _pad128(n: int) -> int:
    return ((n + 127) // 128) * 128


def _pad2(a, rows, cols):
    r, c = a.shape
    return jnp.pad(a, ((0, rows - r), (0, cols - c)))


def init_raw_params(cfg, key):
    """f32, un-folded parameters mirroring the PyTorch module layout."""
    Wk, Cc, T = cfg["enc_window_size"], cfg["enc_channels"], cfg["enc_seq_len"]
    D, H, C = cfg["enc_node_dim"], cfg["mlp_hidden_features"], cfg["mlp_class_num"]
    L = T // Wk
    assert cfg["mlp_in_features"] == D, "mlp_in_features must equal enc_node_dim"
    ks = jax.random.split(key, 4)
    return {
        "conv_w": 0.1 * jax.random.normal(ks[0], (Cc, Wk), jnp.float32),    # Conv1d(1,Cc,Wk).weight
        "conv_b": jnp.zeros((Cc,), jnp.float32),
        "rep_w": 0.1 * jax.random.normal(ks[1], (Cc * L, D), jnp.float32),  # acts on channel-major flatten
        "rep_b": jnp.zeros((D,), jnp.float32),
        "w1": 0.1 * jax.random.normal(ks[2], (D, H), jnp.float32),
        "b1": jnp.zeros((H,), jnp.float32),
        "w2": 0.1 * jax.random.normal(ks[3], (H, C), jnp.float32),
        "b2": jnp.zeros((C,), jnp.float32),
    }


def fold_params(raw, cfg, weight_dtype=jnp.bfloat16):
    """Fold rep-linear into MLP layer 1 (in f32, then cast) and pad lane dims to 128."""
    Wk, Cc, T = cfg["enc_window_size"], cfg["enc_channels"], cfg["enc_seq_len"]
    H, C = cfg["mlp_hidden_features"], cfg["mlp_class_num"]
    L = T // Wk
    Ph, Pc2 = _pad128(H), _pad128(C)

    # mean_n commutes with the rep linear, and no nonlinearity separates the rep linear
    # from MLP layer 1, so Wf = Wrep @ W1 / bf = brep @ W1 + b1 is an exact f32 fold.
    wf = raw["rep_w"] @ raw["w1"]                      # (Cc*L, H)
    bf = raw["rep_b"] @ raw["w1"] + raw["b1"]          # (H,)

    return {
        "kw": jnp.transpose(raw["conv_w"]).reshape(Wk * Cc).astype(jnp.float32),  # [w*Cc + c]
        "kb": raw["conv_b"].astype(jnp.float32),
        # Zero lane-padding is exact: padded h1 columns are relu(0+0)=0, the matching
        # padded w2 rows are 0, and padded logits are sliced off outside the kernel.
        "wf": _pad2(wf, Cc * L, Ph).astype(weight_dtype),
        "bf": _pad2(bf[None, :], 1, Ph).astype(jnp.float32),
        "w2": _pad2(raw["w2"], Ph, Pc2).astype(weight_dtype),
        "b2": _pad2(raw["b2"][None, :], 1, Pc2).astype(jnp.float32),
    }


# ----------------------------------------------------------------------------
# References: f32 un-folded module math (fidelity) + folded/bf16 path (tight check).
# ----------------------------------------------------------------------------
def basenet_reference_module(x, raw, cfg):
    B, N, T = x.shape
    Wk, Cc = cfg["enc_window_size"], cfg["enc_channels"]
    L = T // Wk
    xw = x[..., :L * Wk].reshape(B, N, L, Wk)
    conv = jnp.einsum("bnlw,cw->bncl", xw, raw["conv_w"]) + raw["conv_b"][None, None, :, None]
    h = jnp.maximum(conv, 0.0).reshape(B, N, Cc * L)       # Flatten((Cc, L)) -> channel-major
    reps = h @ raw["rep_w"] + raw["rep_b"]                 # encoder node_rep (B, N, D)
    pooled = reps.mean(axis=1)                             # x.mean(dim=1)
    h1 = jnp.maximum(pooled @ raw["w1"] + raw["b1"], 0.0)
    return h1 @ raw["w2"] + raw["b2"]


def basenet_reference_folded(x, params, cfg):
    B, N, T = x.shape
    Wk, Cc, C = cfg["enc_window_size"], cfg["enc_channels"], cfg["mlp_class_num"]
    L = T // Wk
    kw = params["kw"].reshape(Wk, Cc)
    xw = x[..., :L * Wk].reshape(B, N, L, Wk)
    conv = jnp.einsum("bnlw,wc->bnlc", xw, kw) + params["kb"]
    h = jnp.maximum(conv, 0.0)
    pooled = h.mean(axis=1).transpose(0, 2, 1).reshape(B, Cc * L)   # channel-major
    h1 = jnp.dot(pooled.astype(jnp.bfloat16), params["wf"],
                 preferred_element_type=jnp.float32) + params["bf"]
    h1 = jnp.maximum(h1, 0.0)
    y = jnp.dot(h1.astype(jnp.bfloat16), params["w2"],
                preferred_element_type=jnp.float32) + params["b2"]
    return y[:, :C]


if __name__ == "__main__":
    cfg = dict(
        enc_channels=4,
        enc_window_size=4,
        enc_seq_len=16,
        enc_node_dim=32,
        mlp_in_features=32,
        mlp_hidden_features=32,
        mlp_class_num=2,
    )
    B, N = 2, 8                                            # batch, nodes
    kx, kp = jax.random.split(jax.random.PRNGKey(0))
    x = jax.random.normal(kx, (B, N, cfg["enc_seq_len"]), dtype=jnp.float32)

    raw = init_raw_params(cfg, kp)
    params = fold_params(raw, cfg)

    fwd = jax.jit(functools.partial(basenet_forward, cfg=cfg))
    out = jax.block_until_ready(fwd(x, params))

    assert out.shape == (B, cfg["mlp_class_num"]), out.shape
    assert bool(jnp.all(jnp.isfinite(out)))

    # Tight check: same folded / bf16 math as the kernel.
    ref_folded = basenet_reference_folded(x, params, cfg)
    assert jnp.allclose(out, ref_folded, rtol=3e-3, atol=3e-4), (out, ref_folded)

    # Fidelity check: f32, un-folded module math (tolerance covers bf16 weight rounding).
    ref_module = basenet_reference_module(x, raw, cfg)
    assert jnp.allclose(out, ref_module, rtol=5e-2, atol=2e-2), (out, ref_module)

    print("KERNEL_OK")
</pallas_src>

<mosaic_0001>
module attributes {stable_mosaic.version = 11 : i64} {
  func.func @_basenet_kernel(%arg0: i32, %arg1: memref<8x4x32xf32, #tpu.memory_space<vmem>>, %arg2: memref<16xf32, #tpu.memory_space<smem>>, %arg3: memref<4xf32, #tpu.memory_space<smem>>, %arg4: memref<16x128xbf16, #tpu.memory_space<vmem>>, %arg5: memref<1x128xf32, #tpu.memory_space<vmem>>, %arg6: memref<128x128xbf16, #tpu.memory_space<vmem>>, %arg7: memref<1x128xf32, #tpu.memory_space<vmem>>, %arg8: memref<8x128xf32, #tpu.memory_space<vmem>>) attributes {dimension_semantics = [#tpu.dimension_semantics<parallel>], iteration_bounds = array<i64: 2>, scalar_prefetch = 0 : i64, scratch_operands = 0 : i64, tpu.core_type = #tpu.core_type<tc>, window_params = [{transform_indices = @transform_0, window_bounds = array<i64: 8, 4, 32>}, {transform_indices = @transform_1, window_bounds = array<i64: 16>}, {transform_indices = @transform_2, window_bounds = array<i64: 4>}, {pipeline_mode = #tpu.pipeline_mode<synchronous>, transform_indices = @transform_3, window_bounds = array<i64: 16, 128>}, {pipeline_mode = #tpu.pipeline_mode<synchronous>, transform_indices = @transform_4, window_bounds = array<i64: 1, 128>}, {pipeline_mode = #tpu.pipeline_mode<synchronous>, transform_indices = @transform_5, window_bounds = array<i64: 128, 128>}, {pipeline_mode = #tpu.pipeline_mode<synchronous>, transform_indices = @transform_6, window_bounds = array<i64: 1, 128>}, {transform_indices = @transform_7, window_bounds = array<i64: 8, 128>}]} {
    %c0 = arith.constant 0 : index
    %c0_0 = arith.constant 0 : index
    %c0_1 = arith.constant 0 : index
    %0 = vector.load %arg1[%c0, %c0_0, %c0_1] : memref<8x4x32xf32, #tpu.memory_space<vmem>>, vector<8x1x32xf32>
    %1 = vector.shape_cast %0 : vector<8x1x32xf32> to vector<8x32xf32>
    %c0_2 = arith.constant 0 : index
    %c1 = arith.constant 1 : index
    %c0_3 = arith.constant 0 : index
    %2 = vector.load %arg1[%c0_2, %c1, %c0_3] : memref<8x4x32xf32, #tpu.memory_space<vmem>>, vector<8x1x32xf32>
    %3 = vector.shape_cast %2 : vector<8x1x32xf32> to vector<8x32xf32>
    %c0_4 = arith.constant 0 : index
    %c2 = arith.constant 2 : index
    %c0_5 = arith.constant 0 : index
    %4 = vector.load %arg1[%c0_4, %c2, %c0_5] : memref<8x4x32xf32, #tpu.memory_space<vmem>>, vector<8x1x32xf32>
    %5 = vector.shape_cast %4 : vector<8x1x32xf32> to vector<8x32xf32>
    %c0_6 = arith.constant 0 : index
    %c3 = arith.constant 3 : index
    %c0_7 = arith.constant 0 : index
    %6 = vector.load %arg1[%c0_6, %c3, %c0_7] : memref<8x4x32xf32, #tpu.memory_space<vmem>>, vector<8x1x32xf32>
    %7 = vector.shape_cast %6 : vector<8x1x32xf32> to vector<8x32xf32>
    %c0_8 = arith.constant 0 : index
    %8 = memref.load %arg2[%c0_8] : memref<16xf32, #tpu.memory_space<smem>>
    %9 = vector.broadcast %8 : f32 to vector<8x32xf32>
    %10 = arith.mulf %1, %9 : vector<8x32xf32>
    %c4 = arith.constant 4 : index
    %11 = memref.load %arg2[%c4] : memref<16xf32, #tpu.memory_space<smem>>
    %12 = vector.broadcast %11 : f32 to vector<8x32xf32>
    %13 = arith.mulf %3, %12 : vector<8x32xf32>
    %14 = arith.addf %10, %13 : vector<8x32xf32>
    %c8 = arith.constant 8 : index
    %15 = memref.load %arg2[%c8] : memref<16xf32, #tpu.memory_space<smem>>
    %16 = vector.broadcast %15 : f32 to vector<8x32xf32>
    %17 = arith.mulf %5, %16 : vector<8x32xf32>
    %18 = arith.addf %14, %17 : vector<8x32xf32>
    %c12 = arith.constant 12 : index
    %19 = memref.load %arg2[%c12] : memref<16xf32, #tpu.memory_space<smem>>
    %20 = vector.broadcast %19 : f32 to vector<8x32xf32>
    %21 = arith.mulf %7, %20 : vector<8x32xf32>
    %22 = arith.addf %18, %21 : vector<8x32xf32>
    %c0_9 = arith.constant 0 : index
    %23 = memref.load %arg3[%c0_9] : memref<4xf32, #tpu.memory_space<smem>>
    %24 = vector.broadcast %23 : f32 to vector<8x32xf32>
    %25 = arith.addf %22, %24 : vector<8x32xf32>
    %cst = arith.constant 0.000000e+00 : f32
    %26 = vector.broadcast %cst : f32 to vector<8x32xf32>
    %27 = arith.maximumf %25, %26 : vector<8x32xf32>
    %28 = vector.extract_strided_slice %27 {offsets = [0, 0], sizes = [8, 4], strides = [1, 1]} : vector<8x32xf32> to vector<8x4xf32>
    %29 = vector.extract_strided_slice %27 {offsets = [0, 4], sizes = [8, 4], strides = [1, 1]} : vector<8x32xf32> to vector<8x4xf32>
    %30 = arith.addf %28, %29 : vector<8x4xf32>
    %31 = vector.extract_strided_slice %27 {offsets = [0, 8], sizes = [8, 4], strides = [1, 1]} : vector<8x32xf32> to vector<8x4xf32>
    %32 = arith.addf %30, %31 : vector<8x4xf32>
    %33 = vector.extract_strided_slice %27 {offsets = [0, 12], sizes = [8, 4], strides = [1, 1]} : vector<8x32xf32> to vector<8x4xf32>
    %34 = arith.addf %32, %33 : vector<8x4xf32>
    %35 = vector.extract_strided_slice %27 {offsets = [0, 16], sizes = [8, 4], strides = [1, 1]} : vector<8x32xf32> to vector<8x4xf32>
    %36 = arith.addf %34, %35 : vector<8x4xf32>
    %37 = vector.extract_strided_slice %27 {offsets = [0, 20], sizes = [8, 4], strides = [1, 1]} : vector<8x32xf32> to vector<8x4xf32>
    %38 = arith.addf %36, %37 : vector<8x4xf32>
    %39 = vector.extract_strided_slice %27 {offsets = [0, 24], sizes = [8, 4], strides = [1, 1]} : vector<8x32xf32> to vector<8x4xf32>
    %40 = arith.addf %38, %39 : vector<8x4xf32>
    %41 = vector.extract_strided_slice %27 {offsets = [0, 28], sizes = [8, 4], strides = [1, 1]} : vector<8x32xf32> to vector<8x4xf32>
    %42 = arith.addf %40, %41 : vector<8x4xf32>
    %cst_10 = arith.constant 1.250000e-01 : f32
    %43 = vector.broadcast %cst_10 : f32 to vector<8x4xf32>
    %44 = arith.mulf %42, %43 : vector<8x4xf32>
    %c1_11 = arith.constant 1 : index
    %45 = memref.load %arg2[%c1_11] : memref<16xf32, #tpu.memory_space<smem>>
    %46 = vector.broadcast %45 : f32 to vector<8x32xf32>
    %47 = arith.mulf %1, %46 : vector<8x32xf32>
    %c5 = arith.constant 5 : index
    %48 = memref.load %arg2[%c5] : memref<16xf32, #tpu.memory_space<smem>>
    %49 = vector.broadcast %48 : f32 to vector<8x32xf32>
    %50 = arith.mulf %3, %49 : vector<8x32xf32>
    %51 = arith.addf %47, %50 : vector<8x32xf32>
    %c9 = arith.constant 9 : index
    %52 = memref.load %arg2[%c9] : memref<16xf32, #tpu.memory_space<smem>>
    %53 = vector.broadcast %52 : f32 to vector<8x32xf32>
    %54 = arith.mulf %5, %53 : vector<8x32xf32>
    %55 = arith.addf %51, %54 : vector<8x32xf32>
    %c13 = arith.constant 13 : index
    %56 = memref.load %arg2[%c13] : memref<16xf32, #tpu.memory_space<smem>>
    %57 = vector.broadcast %56 : f32 to vector<8x32xf32>
    %58 = arith.mulf %7, %57 : vector<8x32xf32>
    %59 = arith.addf %55, %58 : vector<8x32xf32>
    %c1_12 = arith.constant 1 : index
    %60 = memref.load %arg3[%c1_12] : memref<4xf32, #tpu.memory_space<smem>>
    %61 = vector.broadcast %60 : f32 to vector<8x32xf32>
    %62 = arith.addf %59, %61 : vector<8x32xf32>
    %cst_13 = arith.constant 0.000000e+00 : f32
    %63 = vector.broadcast %cst_13 : f32 to vector<8x32xf32>
    %64 = arith.maximumf %62, %63 : vector<8x32xf32>
    %65 = vector.extract_strided_slice %64 {offsets = [0, 0], sizes = [8, 4], strides = [1, 1]} : vector<8x32xf32> to vector<8x4xf32>
    %66 = vector.extract_strided_slice %64 {offsets = [0, 4], sizes = [8, 4], strides = [1, 1]} : vector<8x32xf32> to vector<8x4xf32>
    %67 = arith.addf %65, %66 : vector<8x4xf32>
    %68 = vector.extract_strided_slice %64 {offsets = [0, 8], sizes = [8, 4], strides = [1, 1]} : vector<8x32xf32> to vector<8x4xf32>
    %69 = arith.addf %67, %68 : vector<8x4xf32>
    %70 = vector.extract_strided_slice %64 {offsets = [0, 12], sizes = [8, 4], strides = [1, 1]} : vector<8x32xf32> to vector<8x4xf32>
    %71 = arith.addf %69, %70 : vector<8x4xf32>
    %72 = vector.extract_strided_slice %64 {offsets = [0, 16], sizes = [8, 4], strides = [1, 1]} : vector<8x32xf32> to vector<8x4xf32>
    %73 = arith.addf %71, %72 : vector<8x4xf32>
    %74 = vector.extract_strided_slice %64 {offsets = [0, 20], sizes = [8, 4], strides = [1, 1]} : vector<8x32xf32> to vector<8x4xf32>
    %75 = arith.addf %73, %74 : vector<8x4xf32>
    %76 = vector.extract_strided_slice %64 {offsets = [0, 24], sizes = [8, 4], strides = [1, 1]} : vector<8x32xf32> to vector<8x4xf32>
    %77 = arith.addf %75, %76 : vector<8x4xf32>
    %78 = vector.extract_strided_slice %64 {offsets = [0, 28], sizes = [8, 4], strides = [1, 1]} : vector<8x32xf32> to vector<8x4xf32>
    %79 = arith.addf %77, %78 : vector<8x4xf32>
    %cst_14 = arith.constant 1.250000e-01 : f32
    %80 = vector.broadcast %cst_14 : f32 to vector<8x4xf32>
    %81 = arith.mulf %79, %80 : vector<8x4xf32>
    %c2_15 = arith.constant 2 : index
    %82 = memref.load %arg2[%c2_15] : memref<16xf32, #tpu.memory_space<smem>>
    %83 = vector.broadcast %82 : f32 to vector<8x32xf32>
    %84 = arith.mulf %1, %83 : vector<8x32xf32>
    %c6 = arith.constant 6 : index
    %85 = memref.load %arg2[%c6] : memref<16xf32, #tpu.memory_space<smem>>
    %86 = vector.broadcast %85 : f32 to vector<8x32xf32>
    %87 = arith.mulf %3, %86 : vector<8x32xf32>
    %88 = arith.addf %84, %87 : vector<8x32xf32>
    %c10 = arith.constant 10 : index
    %89 = memref.load %arg2[%c10] : memref<16xf32, #tpu.memory_space<smem>>
    %90 = vector.broadcast %89 : f32 to vector<8x32xf32>
    %91 = arith.mulf %5, %90 : vector<8x32xf32>
    %92 = arith.addf %88, %91 : vector<8x32xf32>
    %c14 = arith.constant 14 : index
    %93 = memref.load %arg2[%c14] : memref<16xf32, #tpu.memory_space<smem>>
    %94 = vector.broadcast %93 : f32 to vector<8x32xf32>
    %95 = arith.mulf %7, %94 : vector<8x32xf32>
    %96 = arith.addf %92, %95 : vector<8x32xf32>
    %c2_16 = arith.constant 2 : index
    %97 = memref.load %arg3[%c2_16] : memref<4xf32, #tpu.memory_space<smem>>
    %98 = vector.broadcast %97 : f32 to vector<8x32xf32>
    %99 = arith.addf %96, %98 : vector<8x32xf32>
    %cst_17 = arith.constant 0.000000e+00 : f32
    %100 = vector.broadcast %cst_17 : f32 to vector<8x32xf32>
    %101 = arith.maximumf %99, %100 : vector<8x32xf32>
    %102 = vector.extract_strided_slice %101 {offsets = [0, 0], sizes = [8, 4], strides = [1, 1]} : vector<8x32xf32> to vector<8x4xf32>
    %103 = vector.extract_strided_slice %101 {offsets = [0, 4], sizes = [8, 4], strides = [1, 1]} : vector<8x32xf32> to vector<8x4xf32>
    %104 = arith.addf %102, %103 : vector<8x4xf32>
    %105 = vector.extract_strided_slice %101 {offsets = [0, 8], sizes = [8, 4], strides = [1, 1]} : vector<8x32xf32> to vector<8x4xf32>
    %106 = arith.addf %104, %105 : vector<8x4xf32>
    %107 = vector.extract_strided_slice %101 {offsets = [0, 12], sizes = [8, 4], strides = [1, 1]} : vector<8x32xf32> to vector<8x4xf32>
    %108 = arith.addf %106, %107 : vector<8x4xf32>
    %109 = vector.extract_strided_slice %101 {offsets = [0, 16], sizes = [8, 4], strides = [1, 1]} : vector<8x32xf32> to vector<8x4xf32>
    %110 = arith.addf %108, %109 : vector<8x4xf32>
    %111 = vector.extract_strided_slice %101 {offsets = [0, 20], sizes = [8, 4], strides = [1, 1]} : vector<8x32xf32> to vector<8x4xf32>
    %112 = arith.addf %110, %111 : vector<8x4xf32>
    %113 = vector.extract_strided_slice %101 {offsets = [0, 24], sizes = [8, 4], strides = [1, 1]} : vector<8x32xf32> to vector<8x4xf32>
    %114 = arith.addf %112, %113 : vector<8x4xf32>
    %115 = vector.extract_strided_slice %101 {offsets = [0, 28], sizes = [8, 4], strides = [1, 1]} : vector<8x32xf32> to vector<8x4xf32>
    %116 = arith.addf %114, %115 : vector<8x4xf32>
    %cst_18 = arith.constant 1.250000e-01 : f32
    %117 = vector.broadcast %cst_18 : f32 to vector<8x4xf32>
    %118 = arith.mulf %116, %117 : vector<8x4xf32>
    %c3_19 = arith.constant 3 : index
    %119 = memref.load %arg2[%c3_19] : memref<16xf32, #tpu.memory_space<smem>>
    %120 = vector.broadcast %119 : f32 to vector<8x32xf32>
    %121 = arith.mulf %1, %120 : vector<8x32xf32>
    %c7 = arith.constant 7 : index
    %122 = memref.load %arg2[%c7] : memref<16xf32, #tpu.memory_space<smem>>
    %123 = vector.broadcast %122 : f32 to vector<8x32xf32>
    %124 = arith.mulf %3, %123 : vector<8x32xf32>
    %125 = arith.addf %121, %124 : vector<8x32xf32>
    %c11 = arith.constant 11 : index
    %126 = memref.load %arg2[%c11] : memref<16xf32, #tpu.memory_space<smem>>
    %127 = vector.broadcast %126 : f32 to vector<8x32xf32>
    %128 = arith.mulf %5, %127 : vector<8x32xf32>
    %129 = arith.addf %125, %128 : vector<8x32xf32>
    %c15 = arith.constant 15 : index
    %130 = memref.load %arg2[%c15] : memref<16xf32, #tpu.memory_space<smem>>
    %131 = vector.broadcast %130 : f32 to vector<8x32xf32>
    %132 = arith.mulf %7, %131 : vector<8x32xf32>
    %133 = arith.addf %129, %132 : vector<8x32xf32>
    %c3_20 = arith.constant 3 : index
    %134 = memref.load %arg3[%c3_20] : memref<4xf32, #tpu.memory_space<smem>>
    %135 = vector.broadcast %134 : f32 to vector<8x32xf32>
    %136 = arith.addf %133, %135 : vector<8x32xf32>
    %cst_21 = arith.constant 0.000000e+00 : f32
    %137 = vector.broadcast %cst_21 : f32 to vector<8x32xf32>
    %138 = arith.maximumf %136, %137 : vector<8x32xf32>
    %139 = vector.extract_strided_slice %138 {offsets = [0, 0], sizes = [8, 4], strides = [1, 1]} : vector<8x32xf32> to vector<8x4xf32>
    %140 = vector.extract_strided_slice %138 {offsets = [0, 4], sizes = [8, 4], strides = [1, 1]} : vector<8x32xf32> to vector<8x4xf32>
    %141 = arith.addf %139, %140 : vector<8x4xf32>
    %142 = vector.extract_strided_slice %138 {offsets = [0, 8], sizes = [8, 4], strides = [1, 1]} : vector<8x32xf32> to vector<8x4xf32>
    %143 = arith.addf %141, %142 : vector<8x4xf32>
    %144 = vector.extract_strided_slice %138 {offsets = [0, 12], sizes = [8, 4], strides = [1, 1]} : vector<8x32xf32> to vector<8x4xf32>
    %145 = arith.addf %143, %144 : vector<8x4xf32>
    %146 = vector.extract_strided_slice %138 {offsets = [0, 16], sizes = [8, 4], strides = [1, 1]} : vector<8x32xf32> to vector<8x4xf32>
    %147 = arith.addf %145, %146 : vector<8x4xf32>
    %148 = vector.extract_strided_slice %138 {offsets = [0, 20], sizes = [8, 4], strides = [1, 1]} : vector<8x32xf32> to vector<8x4xf32>
    %149 = arith.addf %147, %148 : vector<8x4xf32>
    %150 = vector.extract_strided_slice %138 {offsets = [0, 24], sizes = [8, 4], strides = [1, 1]} : vector<8x32xf32> to vector<8x4xf32>
    %151 = arith.addf %149, %150 : vector<8x4xf32>
    %152 = vector.extract_strided_slice %138 {offsets = [0, 28], sizes = [8, 4], strides = [1, 1]} : vector<8x32xf32> to vector<8x4xf32>
    %153 = arith.addf %151, %152 : vector<8x4xf32>
    %cst_22 = arith.constant 1.250000e-01 : f32
    %154 = vector.broadcast %cst_22 : f32 to vector<8x4xf32>
    %155 = arith.mulf %153, %154 : vector<8x4xf32>
    %156 = tpu.concatenate %44, %81, %118, %155 in 1 : vector<8x4xf32>, vector<8x4xf32>, vector<8x4xf32>, vector<8x4xf32> -> vector<8x16xf32>
    %157 = arith.truncf %156 : vector<8x16xf32> to vector<8x16xbf16>
    %c0_23 = arith.constant 0 : index
    %c0_24 = arith.constant 0 : index
    %158 = vector.load %arg4[%c0_23, %c0_24] : memref<16x128xbf16, #tpu.memory_space<vmem>>, vector<16x128xbf16>
    %cst_25 = arith.constant dense<0.000000e+00> : vector<8x128xf32>
    %159 = tpu.matmul %157, %158, %cst_25 {dimension_numbers = #tpu.dot_dimension_numbers<[1], [0], [0], [1], [0, 0, 1, 1], [], []>} : vector<8x16xbf16>, vector<16x128xbf16>, vector<8x128xf32> -> vector<8x128xf32>
    %c0_26 = arith.constant 0 : index
    %c0_27 = arith.constant 0 : index
    %160 = vector.load %arg5[%c0_26, %c0_27] : memref<1x128xf32, #tpu.memory_space<vmem>>, vector<1x128xf32>
    %161 = vector.broadcast %160 : vector<1x128xf32> to vector<8x128xf32>
    %162 = arith.addf %159, %161 : vector<8x128xf32>
    %cst_28 = arith.constant 0.000000e+00 : f32
    %163 = vector.broadcast %cst_28 : f32 to vector<8x128xf32>
    %164 = arith.maximumf %162, %163 : vector<8x128xf32>
    %165 = arith.truncf %164 : vector<8x128xf32> to vector<8x128xbf16>
    %c0_29 = arith.constant 0 : index
    %c0_30 = arith.constant 0 : index
    %166 = vector.load %arg6[%c0_29, %c0_30] : memref<128x128xbf16, #tpu.memory_space<vmem>>, vector<128x128xbf16>
    %cst_31 = arith.constant dense<0.000000e+00> : vector<8x128xf32>
    %167 = tpu.matmul %165, %166, %cst_31 {dimension_numbers = #tpu.dot_dimension_numbers<[1], [0], [0], [1], [0, 0, 1, 1], [], []>} : vector<8x128xbf16>, vector<128x128xbf16>, vector<8x128xf32> -> vector<8x128xf32>
    %c0_32 = arith.constant 0 : index
    %c0_33 = arith.constant 0 : index
    %168 = vector.load %arg7[%c0_32, %c0_33] : memref<1x128xf32, #tpu.memory_space<vmem>>, vector<1x128xf32>
    %169 = vector.broadcast %168 : vector<1x128xf32> to vector<8x128xf32>
    %170 = arith.addf %167, %169 : vector<8x128xf32>
    %c0_34 = arith.constant 0 : index
    %c0_35 = arith.constant 0 : index
    %171 = vector.load %arg8[%c0_34, %c0_35] : memref<8x128xf32, #tpu.memory_space<vmem>>, vector<8x128xf32>
    tpu.vector_store %arg8[%c0_34, %c0_35], %170 {strides = array<i32>} : memref<8x128xf32, #tpu.memory_space<vmem>>, vector<8x128xf32>,
    return
  }
  func.func @transform_0(%arg0: i32) -> (i32, i32, i32) {
    %c0_i32 = arith.constant 0 : i32
    %c0_i32_0 = arith.constant 0 : i32
    %c0_i32_1 = arith.constant 0 : i32
    return %arg0, %c0_i32, %c0_i32_0 : i32, i32, i32
  }
  func.func @transform_1(%arg0: i32) -> i32 {
    %c0_i32 = arith.constant 0 : i32
    %c0_i32_0 = arith.constant 0 : i32
    return %c0_i32 : i32
  }
  func.func @transform_2(%arg0: i32) -> i32 {
    %c0_i32 = arith.constant 0 : i32
    %c0_i32_0 = arith.constant 0 : i32
    return %c0_i32 : i32
  }
  func.func @transform_3(%arg0: i32) -> (i32, i32) {
    %c0_i32 = arith.constant 0 : i32
    %c0_i32_0 = arith.constant 0 : i32
    %c0_i32_1 = arith.constant 0 : i32
    return %c0_i32, %c0_i32_0 : i32, i32
  }
  func.func @transform_4(%arg0: i32) -> (i32, i32) {
    %c0_i32 = arith.constant 0 : i32
    %c0_i32_0 = arith.constant 0 : i32
    %c0_i32_1 = arith.constant 0 : i32
    return %c0_i32, %c0_i32_0 : i32, i32
  }
  func.func @transform_5(%arg0: i32) -> (i32, i32) {
    %c0_i32 = arith.constant 0 : i32
    %c0_i32_0 = arith.constant 0 : i32
    %c0_i32_1 = arith.constant 0 : i32
    return %c0_i32, %c0_i32_0 : i32, i32
  }
  func.func @transform_6(%arg0: i32) -> (i32, i32) {
    %c0_i32 = arith.constant 0 : i32
    %c0_i32_0 = arith.constant 0 : i32
    %c0_i32_1 = arith.constant 0 : i32
    return %c0_i32, %c0_i32_0 : i32, i32
  }
  func.func @transform_7(%arg0: i32) -> (i32, i32) {
    %c0_i32 = arith.constant 0 : i32
    %c0_i32_0 = arith.constant 0 : i32
    return %arg0, %c0_i32 : i32, i32
  }
}

</mosaic_0001>

<bundles_post_ra>
// kernel: basenet_forward.1
= control target key start
LH: loop header
LB: loop body
LE: loop exit
PB: predicated region body
PF: predicated region fallthrough
CT: control target
= control target key end

     0   :  { %12 = vsyncpa [#allocation3], 0  ;;  %s3832_s0 = inlined_call_operand.vmem [shape: f32[16,4,32], index: 0, kind: input, shape index: {}]   ;;  %s3833_s1 = inlined_call_operand.vmem [shape: f32[16], index: 1, kind: input, shape index: {}]   ;;  %s3834_s2 = inlined_call_operand.vmem [shape: f32[4], index: 2, kind: input, shape index: {}]   ;;  %s3835_s3 = inlined_call_operand.vmem [shape: bf16[16,128], index: 3, kind: input, shape index: {}]   ;;  %s3836_s4 = inlined_call_operand.vmem [shape: f32[1,128], index: 4, kind: input, shape index: {}]   ;;  %s3837_s5 = inlined_call_operand.vmem [shape: bf16[128,128], index: 5, kind: input, shape index: {}]   ;;  %s3838_s6 = inlined_call_operand.vmem [shape: f32[1,128], index: 6, kind: input, shape index: {}]   ;;  %s3839_s7 = inlined_call_operand.vmem [shape: f32[16,128], index: 7, kind: output, shape index: {}]  }
   0x1   :  { %13 = vsyncpa [#allocation5], 0  ;;  %s2235_s24 = smov 0  }
   0x2 LB: > { %s2241_s25 = sadd.s32 4294967295, %s2179_s24   ;;  %p1989_p0 = scmp.ge.s32.totalorder %s2179_s24, 1  ;;  %s2179_s24 = sphi %s2235_s24, %s19_s24  }
   0x3   : > { %p202_p1 = scmp.lt.s32.totalorder %s2179_s24, 3  ;;  %s215_s28 = sshll.u32 %s3833_s1, 4  ;;  %s216_s28 = int_to_ptr.vmem [resolvable:$true] %s215_s28 }
   0x4   : > { %p3840_p3 = scmp.eq.s32.totalorder %s2241_s25, 0  ;;  %s226_s9 = sshll.u32 %s3834_s2, 4  ;;  %s227_s9 = int_to_ptr.vmem [resolvable:$true] %s226_s9 }
   0x5   : > { %p2248_p2 = pnand %p1989_p0, %p202_p1  ;;  %s2135_s11 = scalar_lea.vmem %s216_s28, 16 }
   0x6   : > { %p2136_p6 = scmp.ne.s32.totalorder %s216_s28, %s2135_s11  ;;  %p2143_p10 = scmp.lt.s32.totalorder %s216_s28, %s216_s28 }
   0x7   : > { %s3852_s29 = scalar_select %p2248_p2, 1, 0 }
   0x8   : > { %p2076_p4 = pneg %p2248_p2  ;;  %p2144_p11 = scmp.lt.s32.totalorder %s2135_s11, %s2135_s11 }
   0xa   : > { %p2260_p5 = pnand %p3840_p3, %p2076_p4  ;;  %p2145_p12 = por %p2144_p11, %p2143_p10 }
   0xc   : > { %p2137_p7 = pneg %p2260_p5 }
   0xe   : > { %p2138_p8 = pnand %p2137_p7, %p2136_p6 }
  0x10   : > { %p2139_p9 = pneg %p2138_p8 }
  0x12   : > { %p2146_p13 = pnand %p2145_p12, %p2139_p9 }
  0x14   : > { %2149 = shalt.err (!%p2146_p13)
}
  0x15   : > { %s2181_s12 = smov [#allocation2]   ;;  %s2150_s13 = scalar_lea.vmem %s227_s9, 16 }
  0x16   : > { %2079 = dma.vmem_to_smem (!%p2260_p5), %s216_s28, 16, %s2181_s12, [#allocation3]  }
  0x17   : > { %p2151_p0 = scmp.ne.s32.totalorder %s227_s9, %s2150_s13  ;;  %p2158_p3 = scmp.lt.s32.totalorder %s227_s9, %s227_s9 }
  0x18   : > { %p2159_p2 = scmp.lt.s32.totalorder %s2150_s13, %s2150_s13 }
  0x19   : > { %p2153_p1 = pnand %p2151_p0, %p2137_p7 }
  0x1a   : > { %p2160_p6 = por %p2159_p2, %p2158_p3 }
  0x1b   : > { %p2154_p4 = pneg %p2153_p1 }
  0x1d   : > { %p2161_p8 = pnand %p2160_p6, %p2154_p4 }
  0x1f   : > { %2164 = shalt.err (!%p2161_p8)
}
  0x20   : > { %s2182_s14 = smov [#allocation4]   ;;  %p3854_p9 = scmp.ne.s32.totalorder %s3852_s29, 0 }
  0x21   : > { %2082 = dma.vmem_to_smem (!%p2260_p5), %s227_s9, 16, %s2182_s14, [#allocation5]  }
  0x22   : > { %260 = sbr.rel (%p3854_p9) target bundleno = 1081 (0x439), region = 48 }
  0x29   : > { %p3855_p10 = scmp.eq.s32.totalorder %s2241_s25, 0 }
  0x2b   : > { %2170 = dma.done.wait (%p3855_p10), [#allocation3], 16   ;;  %p3856_p11 = pmov %p3855_p10 }
  0x2c   : > { %p3857_p7 = pmov %p3855_p10 }
  0x2d   : > { %2172 = vsyncadd (%p3856_p11), [#allocation3], 4294967280 }
  0x2e   : > { %2174 = dma.done.wait (%p3857_p7), [#allocation5], 16   ;;  %p3858_p2 = pmov %p3857_p7 }
  0x30   : > { %2176 = vsyncadd (%p3858_p2), [#allocation5], 4294967280 }
  0x31   : > { %270 = sfence }
  0x32   : > { %s1996_s15 = sshll.u32 %s2241_s25, 3  ;;  %s2007_s16 = sld [smem:[#allocation2 + $0x2]]  ;;  %vm1636_vm0 = vcmask 1041409   ;;  %vm1639_vm1 = vcmask 1042434   ;;  %vm1642_vm2 = vcmask 1043459   ;;  %vm1645_vm3 = vcmask 1044484  }
  0x33   : > { %p297_p3 = scmp.lt.s32.totalorder %s1996_s15, 15  ;;  %s2008_s17 = sld [smem:[#allocation2 + $0x6]]  ;;  %vm1648_vm4 = vcmask 1045509   ;;  %vm1651_vm5 = vcmask 1046534   ;;  %vm1654_vm6 = vcmask 1047559   ;;  %vm2191_vm7 = vmmov 0  }
  0x34   : > { %s2009_s18 = sld [smem:[#allocation2 + $0xa]]  ;;  %s2010_s19 = sld [smem:[#allocation2 + $0xe]]  ;;  %vm1732_vm8 = vcmask 31744   ;;  %vm1734_vm9 = vcmask 64512   ;;  %vm1736_vm10 = vcmask 97280   ;;  %vm1754_vm11 = vcmask 130048  }
  0x35   : > { %s4128_s15 = smov (!%p297_p3, %s1996_s15), 15  ;;  %s2011_s20 = sld [smem:[#allocation4 + $0x2]] }
  0x36   : > { %s1997_s21 = sshll.u32 %s4128_s15, 2  ;;  %s2002_s22 = sld [smem:[#allocation2 + $0x1]] }
  0x37   : > { %s2284_s27 = scalar_lea.vmem %s3832_s0, %s1997_s21  ;;  %s2003_s28 = sld [smem:[#allocation2 + $0x5]] }
  0x38   : > { %v2287_v0 = vld [vmem:[%s2284_s27 + $0x4] sm:$0x1]  ;;  %v2290_v1 = vld [vmem:[%s2284_s27 + $0x5] sm:$0x1]  ;;  %v2293_v2 = vld [vmem:[%s2284_s27 + $0x6] sm:$0x1]  ;;  %v2295_v3 = vstv %s2007_s16 }
  0x39   : > { %v2298_v4 = vld [vmem:[%s2284_s27 + $0x7] sm:$0x1]  ;;  %v986_v5 = vmul.f32 %v2295_v3, %v2287_v0  ;;  %v2302_v6 = vstv %s2008_s17  ;;  %s2004_s29 = sld [smem:[#allocation2 + $0x9]]  ;;  %s2005_s30 = sld [smem:[#allocation2 + $0xd]]  ;;  %v2313_v10 = vld [vmem:[%s2284_s27 + $0x8] sm:$0x1] }
  0x3a   : > { %v2304_v7 = vstv %s2009_s18  ;;  %v996_v8 = vmul.f32 %v2302_v6, %v2290_v1  ;;  %s2310_s8 = sld [smem:[#allocation4 + $0x1]]  ;;  %v2316_v11 = vld [vmem:[%s2284_s27 + $0x9] sm:$0x1]  ;;  %v2318_v12 = vstv %s2010_s19  ;;  %v2323_v14 = vld [vmem:[%s2284_s27 + $0xa] sm:$0x1]  ;;  %v987_v15 = vmul.f32 %v2295_v3, %v2313_v10  ;;  %s2364_s9 = sld [smem:[#allocation2 + $0x3]] }
  0x3b   : > { %v1014_v9 = vmul.f32 %v2304_v7, %v2293_v2  ;;  %v2320_v13 = vstv %s2011_s20  ;;  %v997_v16 = vmul.f32 %v2302_v6, %v2316_v11  ;;  %v1032_v18 = vmul.f32 %v2318_v12, %v2298_v4  ;;  %v2334_v20 = vld [vmem:[%s2284_s27] sm:$0x1]  ;;  %v2337_v21 = vld [vmem:[%s2284_s27 + $0x1] sm:$0x1]  ;;  %v2350_v27 = vld [vmem:[%s2284_s27 + $0xc] sm:$0x1] }
  0x3c   : > { %v1004_v17 = vadd.f32 %v996_v8, %v986_v5  ;;  %v2331_v19 = vstv %s2002_s22  ;;  %v1015_v22 = vmul.f32 %v2304_v7, %v2323_v14  ;;  %v2353_v28 = vld [vmem:[%s2284_s27 + $0xd] sm:$0x1]  ;;  %v2358_v31 = vld [vmem:[%s2284_s27 + $0xb] sm:$0x1]  ;;  %v2371_v36 = vld [vmem:[%s2284_s27 + $0x2] sm:$0x1] }
  0x3d   : > { %v664_v23 = vmul.f32 %v2331_v19, %v2287_v0  ;;  %v2343_v24 = vstv %s2003_s28  ;;  %v665_v25 = vmul.f32 %v2331_v19, %v2313_v10  ;;  %v663_v26 = vmul.f32 %v2331_v19, %v2334_v20  ;;  %s2377_s10 = sld [smem:[#allocation2 + $0x7]]  ;;  %v2384_v43 = vld [vmem:[%s2284_s27 + $0x3] sm:$0x1]  ;;  %v2387_v44 = vld [vmem:[%s2284_s27 + $0xe] sm:$0x1]  ;;  %s2389_s11 = sld [smem:[#allocation2 + $0xb]] }
  0x3e   : > { %v1022_v29 = vadd.f32 %v1014_v9, %v1004_v17  ;;  %v674_v30 = vmul.f32 %v2343_v24, %v2290_v1  ;;  %v675_v32 = vmul.f32 %v2343_v24, %v2316_v11  ;;  %v673_v33 = vmul.f32 %v2343_v24, %v2337_v21  ;;  %v2399_v49 = vld [vmem:[%s2284_s27 + $0xf] sm:$0x1]  ;;  %s2404_s12 = sld [smem:[#allocation2 + $0xf]]  ;;  %s2406_s13 = sld [smem:[#allocation4 + $0x3]] }
  0x3f   : > { %v2366_v34 = vstv %s2004_s29  ;;  %v2368_v35 = vstv %s2005_s30  ;;  %v666_v37 = vmul.f32 %v2331_v19, %v2350_v27  ;;  %v676_v38 = vmul.f32 %v2343_v24, %v2353_v28  ;;  %s2183_s14 = smov 124   ;;  %s2184_s15 = smov 120  }
  0x40   : > { %v1040_v39 = vadd.f32 %v1032_v18, %v1022_v29  ;;  %v682_v40 = vadd.f32 %v674_v30, %v664_v23  ;;  %v692_v41 = vmul.f32 %v2366_v34, %v2293_v2  ;;  %v710_v42 = vmul.f32 %v2368_v35, %v2298_v4  ;;  %v2434_v30 = vld [vmem:[%s2284_s27 + $0x11] sm:$0x1]  ;;  %s2185_s16 = smov 116   ;;  %s2186_s17 = smov 112  }
  0x41   : > { %v2392_v45 = vstv %s2310_s8  ;;  %v683_v46 = vadd.f32 %v675_v32, %v665_v25  ;;  %v693_v47 = vmul.f32 %v2366_v34, %v2323_v14  ;;  %v711_v48 = vmul.f32 %v2368_v35, %v2358_v31  ;;  %v2428_v25 = vld [vmem:[%s2284_s27 + $0x10] sm:$0x1]  ;;  %v2437_v32 = vld [vmem:[%s2284_s27 + $0x12] sm:$0x1]  ;;  %s2187_s18 = smov 108   ;;  %s2188_s19 = smov 104  }
  0x42   : > { %v1050_v50 = vadd.f32 %v2320_v13, %v1040_v39  ;;  %v700_v51 = vadd.f32 %v692_v41, %v682_v40  ;;  %v681_v52 = vadd.f32 %v673_v33, %v663_v26  ;;  %v691_v53 = vmul.f32 %v2366_v34, %v2371_v36  ;;  %v2440_v33 = vld [vmem:[%s2284_s27 + $0x13] sm:$0x1]  ;;  %s2189_s20 = smov 100   ;;  %s339_s21 = sld [smem:[#allocation2]] }
  0x43   : > { %v701_v54 = vadd.f32 %v693_v47, %v683_v46  ;;  %v709_v55 = vmul.f32 %v2368_v35, %v2384_v43  ;;  %v684_v56 = vadd.f32 %v676_v38, %v666_v37  ;;  %v694_v57 = vmul.f32 %v2366_v34, %v2387_v44  ;;  %s1999_s22 = sld [smem:[#allocation2 + $0x4]]  ;;  %s2000_s23 = sld [smem:[#allocation2 + $0x8]] }
  0x44   : > { %v2412_v58 = vmax.f32 %v1050_v50, 0.0  ;;  %v718_v59 = vadd.f32 %v710_v42, %v700_v51  ;;  %v699_v60 = vadd.f32 %v691_v53, %v681_v52  ;;  %v712_v61 = vmul.f32 %v2368_v35, %v2399_v49  ;;  %s2001_s26 = sld [smem:[#allocation2 + $0xc]]  ;;  %s3238_s28 = sld [smem:[#allocation4]] }
  0x45   : > { %v719_v62 = vadd.f32 %v711_v48, %v701_v54  ;;  %v702_v63 = vadd.f32 %v694_v57, %v684_v56  ;;  %v1005_v5 = vadd.f32 %v997_v16, %v987_v15  ;;  %v1033_v8 = vmul.f32 %v2318_v12, %v2358_v31  ;;  %p302_p5 = scmp.lt.s32.totalorder %s2241_s25, 1 }
  0x46   : > { %1075 = vrot.lane.b32.xlu1 %v2412_v58, %s2183_s14  ;;  %v728_v9 = vadd.f32 %v2392_v45, %v718_v59  ;;  %v717_v17 = vadd.f32 %v709_v55, %v699_v60  ;;  %v2422_v18 = vstv %s2364_s9  ;;  %v2425_v23 = vstv %s2377_s10 }
  0x47   : > { %v729_v26 = vadd.f32 %v2392_v45, %v719_v62  ;;  %v720_v15 = vadd.f32 %v712_v61, %v702_v63  ;;  %v1023_v16 = vadd.f32 %v1015_v22, %v1005_v5  ;;  %v1308_v29 = vmul.f32 %v2422_v18, %v2287_v0  ;;  %s4130_s25 = smov (!%p302_p5, %s2241_s25), 1 }
  0x48   : > { %v2442_v37 = vmax.f32 %v728_v9, 0.0  ;;  %v727_v38 = vadd.f32 %v2392_v45, %v717_v17  ;;  %v1318_v39 = vmul.f32 %v2425_v23, %v2290_v1  ;;  %v2448_v40 = vstv %s2389_s11  ;;  %s2192_s11 = smov 4   ;;  %s1998_s30 = sshll.u32 %s4130_s25, 3 }
  0x49   : > { %v2450_v22 = vmax.f32 %v729_v26, 0.0  ;;  %v730_v0 = vadd.f32 %v2392_v45, %v720_v15  ;;  %v1041_v41 = vadd.f32 %v1033_v8, %v1023_v16  ;;  %v1336_v42 = vmul.f32 %v2448_v40, %v2293_v2  ;;  %v2501_v15 = vld [vmem:[%s2284_s27 + $0x14] sm:$0x1] }
  0x4a   : > { %753 = vrot.lane.b32.xlu0 %v2442_v37, %s2183_s14  ;;  %v2457_v46 = vmax.f32 %v727_v38, 0.0  ;;  %v1326_v47 = vadd.f32 %v1318_v39, %v1308_v29  ;;  %v2460_v48 = vstv %s2404_s12  ;;  %v2463_v50 = vstv %s2406_s13  ;;  %s2193_s12 = smov 8  }
  0x4b   : > { %v2465_v1 = vmax.f32 %v730_v0, 0.0  ;;  %v1051_v51 = vadd.f32 %v2320_v13, %v1041_v41  ;;  %v1354_v52 = vmul.f32 %v2460_v48, %v2298_v4  ;;  %v667_v2 = vmul.f32 %v2331_v19, %v2428_v25  ;;  %v2511_v0 = vld [vmem:[%s2284_s27 + $0x15] sm:$0x1]  ;;  %v2514_v41 = vld [vmem:[%s2284_s27 + $0x16] sm:$0x1] }
  0x4c   : > { %751 = vrot.lane.b32.xlu1 %v2457_v46, %s2183_s14  ;;  %v1344_v53 = vadd.f32 %v1336_v42, %v1326_v47  ;;  %v677_v54 = vmul.f32 %v2343_v24, %v2434_v30  ;;  %v695_v55 = vmul.f32 %v2366_v34, %v2437_v32  ;;  %v713_v56 = vmul.f32 %v2368_v35, %v2440_v33 }
  0x4d   : > { %v2480_v57 = vmax.f32 %v1051_v51, 0.0  ;;  %v985_v4 = vmul.f32 %v2295_v3, %v2334_v20  ;;  %v995_v59 = vmul.f32 %v2302_v6, %v2337_v21  ;;  %v1013_v60 = vmul.f32 %v2304_v7, %v2371_v36  ;;  %3859 = vst [vmem:[#allocation8_spill] sm:$0xff] %v2514_v41 }
  0x4e   : > { %755 = vrot.lane.b32.xlu0 %v2450_v22, %s2183_s14  ;;  %v1362_v61 = vadd.f32 %v1354_v52, %v1344_v53  ;;  %v685_v62 = vadd.f32 %v677_v54, %v667_v2  ;;  %v1031_v63 = vmul.f32 %v2318_v12, %v2384_v43  ;;  %v988_v5 = vmul.f32 %v2295_v3, %v2350_v27  ;;  %v2521_v2 = vld [vmem:[%s2284_s27 + $0x17] sm:$0x1] }
  0x4f   : > { %v1003_v8 = vadd.f32 %v995_v59, %v985_v4  ;;  %v998_v9 = vmul.f32 %v2302_v6, %v2353_v28  ;;  %v1016_v17 = vmul.f32 %v2304_v7, %v2387_v44  ;;  %v1034_v26 = vmul.f32 %v2318_v12, %v2399_v49 }
  0x50   : > { %785 = vrot.lane.b32.xlu1 %v2442_v37, %s2184_s15  ;;  %v1372_v16 = vadd.f32 %v2463_v50, %v1362_v61  ;;  %v703_v29 = vadd.f32 %v695_v55, %v685_v62  ;;  %v1309_v38 = vmul.f32 %v2422_v18, %v2313_v10  ;;  %v1319_v39 = vmul.f32 %v2425_v23, %v2316_v11 }
  0x51   : > { %v1021_v42 = vadd.f32 %v1013_v60, %v1003_v8  ;;  %v1006_v47 = vadd.f32 %v998_v9, %v988_v5  ;;  %v1337_v51 = vmul.f32 %v2448_v40, %v2323_v14  ;;  %v1355_v52 = vmul.f32 %v2460_v48, %v2358_v31 }
  0x52   : > { %757 = vrot.lane.b32.xlu0 %v2465_v1, %s2183_s14  ;;  %v2525_v10 = vmax.f32 %v1372_v16, 0.0  ;;  %v721_v11 = vadd.f32 %v713_v56, %v703_v29  ;;  %v1327_v53 = vadd.f32 %v1319_v39, %v1309_v38  ;;  %v668_v54 = vmul.f32 %v2331_v19, %v2501_v15 }
  0x53   : > { %v1039_v55 = vadd.f32 %v1031_v63, %v1021_v42  ;;  %v1024_v4 = vadd.f32 %v1016_v17, %v1006_v47  ;;  %v678_v14 = vmul.f32 %v2343_v24, %v2511_v0  ;;  %v696_v31 = vmul.f32 %v2366_v34, %v2514_v41 }
  0x54   : > { %1397 = vrot.lane.b32.xlu1 %v2525_v10, %s2183_s14  ;;  %v731_v59 = vadd.f32 %v2392_v45, %v721_v11  ;;  %v1345_v60 = vadd.f32 %v1337_v51, %v1327_v53  ;;  %v714_v56 = vmul.f32 %v2368_v35, %v2521_v2  ;;  %v989_v61 = vmul.f32 %v2295_v3, %v2428_v25 }
  0x55   : > { %v1049_v62 = vadd.f32 %v2320_v13, %v1039_v55  ;;  %v1042_v63 = vadd.f32 %v1034_v26, %v1024_v4  ;;  %v686_v5 = vadd.f32 %v678_v14, %v668_v54  ;;  %v999_v8 = vmul.f32 %v2302_v6, %v2434_v30  ;;  %v2566_v4 = vld [vmem:[%s2284_s27 + $0x18] sm:$0x1]  ;;  %v2569_v14 = vld [vmem:[%s2284_s27 + $0x19] sm:$0x1] }
  0x56   : > { %1077 = vrot.lane.b32.xlu0 %v2480_v57, %s2183_s14  ;;  %v2545_v9 = vmax.f32 %v731_v59, 0.0  ;;  %v1363_v17 = vadd.f32 %v1355_v52, %v1345_v60  ;;  %v1017_v16 = vmul.f32 %v2304_v7, %v2437_v32  ;;  %v1035_v26 = vmul.f32 %v2318_v12, %v2440_v33  ;;  %v2580_v59 = vld [vmem:[%s2284_s27 + $0x1a] sm:$0x1] }
  0x57   : > { %v1052_v29 = vadd.f32 %v2320_v13, %v1042_v63  ;;  %v704_v38 = vadd.f32 %v696_v31, %v686_v5  ;;  %v1007_v39 = vadd.f32 %v999_v8, %v989_v61  ;;  %v1307_v47 = vmul.f32 %v2422_v18, %v2334_v20  ;;  %v2600_v8 = vld [vmem:[%s2284_s27 + $0x1b] sm:$0x1] }
  0x58   : > { %787 = vrot.lane.b32.xlu1 %v2450_v22, %s2184_s15  ;;  %v1373_v42 = vadd.f32 %v2463_v50, %v1363_v17  ;;  %v1317_v51 = vmul.f32 %v2425_v23, %v2337_v21  ;;  %v1335_v52 = vmul.f32 %v2448_v40, %v2371_v36  ;;  %v2561_v11 = vmax.f32 %v1049_v62, 0.0 }
  0x59   : > { %v2563_v53 = vmax.f32 %v1052_v29, 0.0  ;;  %v722_v54 = vadd.f32 %v714_v56, %v704_v38  ;;  %v1025_v55 = vadd.f32 %v1017_v16, %v1007_v39  ;;  %v1353_v21 = vmul.f32 %v2460_v48, %v2384_v43  ;;  %v2604_v29 = vld [vmem:[%s2284_s27 + $0x1c] sm:$0x1] }
  0x5a   : > { %759 = vrot.lane.b32.xlu0 %v2545_v9, %s2183_s14  ;;  %v1325_v20 = vadd.f32 %v1317_v51, %v1307_v47  ;;  %v1310_v36 = vmul.f32 %v2422_v18, %v2350_v27  ;;  %v1320_v31 = vmul.f32 %v2425_v23, %v2353_v28  ;;  %v2582_v60 = vmax.f32 %v1373_v42, 0.0  ;;  %v2612_v42 = vld [vmem:[%s2284_s27 + $0x1e] sm:$0x1] }
  0x5b   : > { %v1043_v56 = vadd.f32 %v1035_v26, %v1025_v55  ;;  %v1338_v61 = vmul.f32 %v2448_v40, %v2387_v44  ;;  %v1356_v62 = vmul.f32 %v2460_v48, %v2399_v49  ;;  %v669_v28 = vmul.f32 %v2331_v19, %v2566_v4  ;;  %v2609_v26 = vld [vmem:[%s2284_s27 + $0x1d] sm:$0x1] }
  0x5c   : > { %3860 = vst [vmem:[#allocation9_spill] sm:$0xff] %v2582_v60  ;;  %1079 = vrot.lane.b32.xlu1 %v2563_v53, %s2183_s14  ;;  %v1343_v27 = vadd.f32 %v1335_v52, %v1325_v20  ;;  %v1328_v43 = vadd.f32 %v1320_v31, %v1310_v36  ;;  %v679_v63 = vmul.f32 %v2343_v24, %v2569_v14  ;;  %v2625_v20 = vld [vmem:[%s2284_s27 + $0x1f] sm:$0x1] }
  0x5d   : > { %v697_v5 = vmul.f32 %v2366_v34, %v2580_v59  ;;  %v732_v44 = vadd.f32 %v2392_v45, %v722_v54  ;;  %v1053_v16 = vadd.f32 %v2320_v13, %v1043_v56  ;;  %v715_v51 = vmul.f32 %v2368_v35, %v2600_v8 }
  0x5e   : > { %1073 = vrot.lane.b32.xlu0 %v2561_v11, %s2183_s14  ;;  %v1346_v49 = vadd.f32 %v1338_v61, %v1328_v43  ;;  %v687_v17 = vadd.f32 %v679_v63, %v669_v28  ;;  %v1361_v38 = vadd.f32 %v1353_v21, %v1343_v27  ;;  %v990_v54 = vmul.f32 %v2295_v3, %v2501_v15 }
  0x5f   : > { %v2618_v52 = vmax.f32 %v732_v44, 0.0  ;;  %v1000_v55 = vmul.f32 %v2302_v6, %v2511_v0  ;;  %v670_v21 = vmul.f32 %v2331_v19, %v2604_v29  ;;  %v2629_v36 = vmax.f32 %v1053_v16, 0.0 }
  0x60   : > { %1399 = vrot.lane.b32.xlu1 %v2582_v60, %s2183_s14  ;;  %v1364_v39 = vadd.f32 %v1356_v62, %v1346_v49  ;;  %v705_v47 = vadd.f32 %v697_v5, %v687_v17  ;;  %v1018_v31 = vmul.f32 %v2304_v7, %v2514_v41  ;;  %v680_v56 = vmul.f32 %v2343_v24, %v2609_v26 }
  0x61   : > { %3861 = vst [vmem:[#allocation10_spill] sm:$0xff] %v2618_v52  ;;  %3862 = vst [vmem:[#allocation11_spill] sm:$0xff] %v2629_v36  ;;  %v698_v61 = vmul.f32 %v2366_v34, %v2612_v42  ;;  %v1371_v62 = vadd.f32 %v2463_v50, %v1361_v38  ;;  %v1036_v19 = vmul.f32 %v2318_v12, %v2521_v2 }
  0x62   : > { %1107 = vrot.lane.b32.xlu0 %v2412_v58, %s2184_s15  ;;  %v1374_v27 = vadd.f32 %v2463_v50, %v1364_v39  ;;  %v991_v43 = vmul.f32 %v2295_v3, %v2566_v4  ;;  %v723_v28 = vadd.f32 %v715_v51, %v705_v47  ;;  %v688_v63 = vadd.f32 %v680_v56, %v670_v21 }
  0x63   : > { %v716_v24 = vmul.f32 %v2368_v35, %v2625_v20  ;;  %v1001_v34 = vmul.f32 %v2302_v6, %v2569_v14  ;;  %v1008_v5 = vadd.f32 %v1000_v55, %v990_v54  ;;  %v1311_v44 = vmul.f32 %v2422_v18, %v2428_v25 }
  0x64   : > { %783 = vrot.lane.b32.xlu1 %v2457_v46, %s2184_s15  ;;  %v1019_v49 = vmul.f32 %v2304_v7, %v2580_v59  ;;  %v1312_v17 = vmul.f32 %v2422_v18, %v2501_v15  ;;  %v1321_v16 = vmul.f32 %v2425_v23, %v2434_v30  ;;  %v706_v35 = vadd.f32 %v698_v61, %v688_v63 }
  0x65   : > { %v1009_v38 = vadd.f32 %v1001_v34, %v991_v43  ;;  %v1037_v39 = vmul.f32 %v2318_v12, %v2600_v8  ;;  %v2663_v47 = vmax.f32 %v1371_v62, 0.0  ;;  %v1322_v51 = vmul.f32 %v2425_v23, %v2511_v0 }
  0x66   : > { %761 = vrot.lane.b32.xlu0 %v2618_v52, %s2183_s14  ;;  %v1340_v54 = vmul.f32 %v2448_v40, %v2514_v41  ;;  %v992_v55 = vmul.f32 %v2295_v3, %v2604_v29  ;;  %v2671_v21 = vmax.f32 %v1374_v27, 0.0  ;;  %v733_v56 = vadd.f32 %v2392_v45, %v723_v28 }
  0x67   : > { %3863 = vst [vmem:[#allocation12_spill] sm:$0xff] %v2663_v47  ;;  %v724_v61 = vadd.f32 %v716_v24, %v706_v35  ;;  %v1027_v43 = vadd.f32 %v1019_v49, %v1009_v38  ;;  %v1330_v62 = vadd.f32 %v1322_v51, %v1312_v17  ;;  %v1358_v63 = vmul.f32 %v2460_v48, %v2521_v2 }
  0x68   : > { %817 = vrot.lane.b32.xlu1 %v2442_v37, %s2185_s16  ;;  %3864 = vst [vmem:[#allocation13_spill] sm:$0xff] %v2671_v21  ;;  %v1002_v34 = vmul.f32 %v2302_v6, %v2609_v26  ;;  %v1020_v41 = vmul.f32 %v2304_v7, %v2612_v42  ;;  %v1038_v28 = vmul.f32 %v2318_v12, %v2625_v20 }
  0x69   : > { %v734_v3 = vadd.f32 %v2392_v45, %v724_v61  ;;  %v1045_v27 = vadd.f32 %v1037_v39, %v1027_v43  ;;  %v1313_v24 = vmul.f32 %v2422_v18, %v2566_v4  ;;  %v1348_v49 = vadd.f32 %v1340_v54, %v1330_v62 }
  0x6a   : > { %789 = vrot.lane.b32.xlu0 %v2465_v1, %s2184_s15  ;;  %v1010_v17 = vadd.f32 %v1002_v34, %v992_v55  ;;  %v1323_v6 = vmul.f32 %v2425_v23, %v2569_v14  ;;  %v1341_v7 = vmul.f32 %v2448_v40, %v2580_v59  ;;  %v1026_v35 = vadd.f32 %v1018_v31, %v1008_v5 }
  0x6b   : > { %v1055_v45 = vadd.f32 %v2320_v13, %v1045_v27  ;;  %v1359_v12 = vmul.f32 %v2460_v48, %v2600_v8  ;;  %v1314_v38 = vmul.f32 %v2422_v18, %v2604_v29  ;;  %v1366_v39 = vadd.f32 %v1358_v63, %v1348_v49 }
  0x6c   : > { %1109 = vrot.lane.b32.xlu1 %v2480_v57, %s2184_s15  ;;  %v1028_v51 = vadd.f32 %v1020_v41, %v1010_v17  ;;  %v1331_v54 = vadd.f32 %v1323_v6, %v1313_v24  ;;  %v1324_v55 = vmul.f32 %v2425_v23, %v2609_v26  ;;  %v2702_v61 = vmax.f32 %v733_v56, 0.0 }
  0x6d   : > { %v1342_v31 = vmul.f32 %v2448_v40, %v2612_v42  ;;  %v1360_v5 = vmul.f32 %v2460_v48, %v2625_v20  ;;  %v1376_v18 = vadd.f32 %v2463_v50, %v1366_v39  ;;  %v1329_v63 = vadd.f32 %v1321_v16, %v1311_v44 }
  0x6e   : > { %1081 = vrot.lane.b32.xlu0 %v2629_v36, %s2183_s14  ;;  %3865 = vst [vmem:[#allocation14_spill] sm:$0xff] %v2702_v61  ;;  %v1046_v43 = vadd.f32 %v1038_v28, %v1028_v51  ;;  %v1349_v62 = vadd.f32 %v1341_v7, %v1331_v54  ;;  %v1332_v41 = vadd.f32 %v1324_v55, %v1314_v38 }
  0x6f   : > { %v1339_v23 = vmul.f32 %v2448_v40, %v2437_v32  ;;  %v1044_v56 = vadd.f32 %v1036_v19, %v1026_v35  ;;  %v1357_v16 = vmul.f32 %v2460_v48, %v2440_v33  ;;  %v2746_v48 = vmax.f32 %v734_v3, 0.0 }
  0x70   : > { %1401 = vrot.lane.b32.xlu1 %v2671_v21, %s2183_s14  ;;  %v1056_v34 = vadd.f32 %v2320_v13, %v1046_v43  ;;  %v1367_v27 = vadd.f32 %v1359_v12, %v1349_v62  ;;  %v1350_v24 = vadd.f32 %v1342_v31, %v1332_v41  ;;  %v2766_v3 = vmax.f32 %v1376_v18, 0.0 }
  0x71   : > { %v1054_v44 = vadd.f32 %v2320_v13, %v1044_v56  ;;  %v1347_v40 = vadd.f32 %v1339_v23, %v1329_v63  ;;  %3868 = vst [vmem:[#allocation17_spill] sm:$0xff] %v2746_v48 }
  0x72   : > { %1395 = vrot.lane.b32.xlu0 %v2663_v47, %s2183_s14  ;;  %v1377_v49 = vadd.f32 %v2463_v50, %v1367_v27  ;;  %v1368_v28 = vadd.f32 %v1360_v5, %v1350_v24  ;;  %v2778_v7 = vmax.f32 %v1056_v34, 0.0 }
  0x73   : > { %v2729_v17 = vmax.f32 %v1054_v44, 0.0  ;;  %v1365_v6 = vadd.f32 %v1357_v16, %v1347_v40 }
  0x74   : > { %763 = vrot.lane.b32.xlu1 %v2702_v61, %s2183_s14  ;;  %v1378_v19 = vadd.f32 %v2463_v50, %v1368_v28  ;;  %v2794_v35 = vmax.f32 %v1377_v49, 0.0 }
  0x75   : > { %3866 = vst [vmem:[#allocation15_spill] sm:$0xff] %v2729_v17  ;;  %v1375_v13 = vadd.f32 %v2463_v50, %v1365_v6  ;;  %v2754_v50 = vmax.f32 %v1055_v45, 0.0 }
  0x76   : > { %1429 = vrot.lane.b32.xlu0 %v2525_v10, %s2184_s15  ;;  %v2822_v51 = vmax.f32 %v1378_v19, 0.0 }
  0x77   : > { %v2740_v33 = vmax.f32 %v1375_v13, 0.0 }
  0x78   : > { %819 = vrot.lane.b32.xlu1 %v2450_v22, %s2185_s16 }
  0x79   : > { %3867 = vst [vmem:[#allocation16_spill] sm:$0xff] %v2740_v33 }
  0x7a   : > { %791 = vrot.lane.b32.xlu0 %v2545_v9, %s2184_s15 }
  0x7c   : > { %1105 = vrot.lane.b32.xlu1 %v2561_v11, %s2184_s15 }
  0x7e   : > { %1083 = vrot.lane.b32.xlu0 %v2729_v17, %s2183_s14 }
  0x80   : > { %1139 = vrot.lane.b32.xlu1 %v2412_v58, %s2185_s16 }
  0x82   : > { %1111 = vrot.lane.b32.xlu0 %v2563_v53, %s2184_s15 }
  0x84   : > { %1431 = vrot.lane.b32.xlu1 %v2582_v60, %s2184_s15 }
  0x86   : > { %1403 = vrot.lane.b32.xlu0 %v2740_v33, %s2183_s14 }
  0x88   : > { %793 = vrot.lane.b32.xlu1 %v2618_v52, %s2184_s15 }
  0x8a   : > { %765 = vrot.lane.b32.xlu0 %v2746_v48, %s2183_s14 }
  0x8c   : > { %821 = vrot.lane.b32.xlu1 %v2465_v1, %s2185_s16 }
  0x8e   : > { %815 = vrot.lane.b32.xlu0 %v2457_v46, %s2185_s16 }
  0x90   : > { %1085 = vrot.lane.b32.xlu1 %v2754_v50, %s2183_s14 }
  0x92   : > { %849 = vrot.lane.b32.xlu0 %v2442_v37, %s2186_s17 }
  0x94   : > { %1141 = vrot.lane.b32.xlu1 %v2480_v57, %s2185_s16 }
  0x96   : > { %1113 = vrot.lane.b32.xlu0 %v2629_v36, %s2184_s15 }
  0x98   : > { %1427 = vrot.lane.b32.xlu1 %v2663_v47, %s2184_s15 }
  0x9a   : > { %1405 = vrot.lane.b32.xlu0 %v2766_v3, %s2183_s14 }
  0x9c   : > { %1461 = vrot.lane.b32.xlu1 %v2525_v10, %s2185_s16 }
  0x9e   : > { %1433 = vrot.lane.b32.xlu0 %v2671_v21, %s2184_s15 }
  0xa0   : > { %823 = vrot.lane.b32.xlu1 %v2545_v9, %s2185_s16 }
  0xa2   : > { %795 = vrot.lane.b32.xlu0 %v2702_v61, %s2184_s15 }
  0xa4   : > { %1087 = vrot.lane.b32.xlu1 %v2778_v7, %s2183_s14 }
  0xa6   : > { %851 = vrot.lane.b32.xlu0 %v2450_v22, %s2186_s17 }
  0xa8   : > { %1137 = vrot.lane.b32.xlu1 %v2561_v11, %s2185_s16 }
  0xaa   : > { %1115 = vrot.lane.b32.xlu0 %v2729_v17, %s2184_s15 }
  0xac   : > { %1171 = vrot.lane.b32.xlu1 %v2412_v58, %s2186_s17 }
  0xae   : > { %1143 = vrot.lane.b32.xlu0 %v2563_v53, %s2185_s16 }
  0xb0   : > { %1435 = vrot.lane.b32.xlu1 %v2740_v33, %s2184_s15 }
  0xb2   : > { %1407 = vrot.lane.b32.xlu0 %v2794_v35, %s2183_s14 }
  0xb4   : > { %797 = vrot.lane.b32.xlu1 %v2746_v48, %s2184_s15 }
  0xb6   : > { %1463 = vrot.lane.b32.xlu0 %v2582_v60, %s2185_s16 }
  0xb8   : > { %847 = vrot.lane.b32.xlu1 %v2457_v46, %s2186_s17  ;;  %v2806_v45 = vpop.permute.xlu1 %1075 }
  0xba   : > { %825 = vrot.lane.b32.xlu0 %v2618_v52, %s2185_s16 }
  0xbc   : > { %v2810_v12 = vpop.permute.xlu0 %753  ;;  %881 = vrot.lane.b32.xlu1 %v2442_v37, %s2187_s18 }
  0xbe   : > { %853 = vrot.lane.b32.xlu0 %v2465_v1, %s2186_s17  ;;  %v2816_v38 = vpop.permute.xlu1 %751 }
  0xc0   : > { %v2818_v39 = vpop.permute.xlu0 %755  ;;  %1145 = vrot.lane.b32.xlu1 %v2629_v36, %s2185_s16 }
  0xc2   : > { %1117 = vrot.lane.b32.xlu0 %v2754_v50, %s2184_s15  ;;  %v2826_v54 = vpop.permute.xlu1 %785 }
  0xc4   : > { %v2828_v55 = vpop.permute.xlu0 %757  ;;  %1409 = vrot.lane.b32.xlu1 %v2822_v51, %s2183_s14 }
  0xc6   : > { %1173 = vrot.lane.b32.xlu0 %v2480_v57, %s2186_s17  ;;  %v2834_v31 = vpop.permute.xlu1 %1397 }
  0xc8   : > { %v2836_v5 = vpop.permute.xlu0 %1077  ;;  %1459 = vrot.lane.b32.xlu1 %v2663_v47, %s2185_s16 }
  0xca   : > { %1437 = vrot.lane.b32.xlu0 %v2766_v3, %s2184_s15  ;;  %v2842_v18 = vpop.permute.xlu1 %787 }
  0xcc   : > { %v2844_v43 = vpop.permute.xlu0 %759  ;;  %1493 = vrot.lane.b32.xlu1 %v2525_v10, %s2186_s17 }
  0xce   : > { %1465 = vrot.lane.b32.xlu0 %v2671_v21, %s2185_s16  ;;  %v2850_v62 = vpop.permute.xlu1 %1079 }
  0xd0   : > { %v2852_v41 = vpop.permute.xlu0 %1073  ;;  %855 = vrot.lane.b32.xlu1 %v2545_v9, %s2186_s17 }
  0xd1   : > { %3869 = vst [vmem:[#allocation18_spill] sm:$0xff] %v2852_v41  ;;  %v2129_v41 = vld [vmem:[%s2284_s27 + $0xe] sm:$0x1] }
  0xd2   : > { %827 = vrot.lane.b32.xlu0 %v2702_v61, %s2185_s16  ;;  %v2858_v63 = vpop.permute.xlu1 %1399 }
  0xd3   : > { %3870 = vst [vmem:[#allocation19_spill] sm:$0xff] %v2858_v63 }
  0xd4   : > { %v2860_v23 = vpop.permute.xlu0 %1107  ;;  %1119 = vrot.lane.b32.xlu1 %v2778_v7, %s2184_s15 }
  0xd5   : > { %3871 = vst [vmem:[#allocation20_spill] sm:$0xff] %v2860_v23  ;;  %v2128_v23 = vld [vmem:[%s2284_s27 + $0x1] sm:$0x1] }
  0xd6   : > { %883 = vrot.lane.b32.xlu0 %v2450_v22, %s2187_s18  ;;  %v2866_v56 = vpop.permute.xlu1 %783 }
  0xd7   : > { %3872 = vst [vmem:[#allocation21_spill] sm:$0xff] %v2866_v56  ;;  %v2124_v56 = vld [vmem:[%s2284_s27 + $0xd] sm:$0x1] }
  0xd8   : > { %v2868_v34 = vpop.permute.xlu0 %761  ;;  %1169 = vrot.lane.b32.xlu1 %v2561_v11, %s2186_s17 }
  0xd9   : > { %3873 = vst [vmem:[#allocation22_spill] sm:$0xff] %v2868_v34  ;;  %v3228_v34 = vstv %s2001_s26 }
  0xda   : > { %1147 = vrot.lane.b32.xlu0 %v2729_v17, %s2185_s16  ;;  %v2874_v27 = vpop.permute.xlu1 %817 }
  0xdb   : > { %3874 = vst [vmem:[#allocation23_spill] sm:$0xff] %v2874_v27  ;;  %v2121_v27 = vld [vmem:[%s2284_s27 + $0x5] sm:$0x1] }
  0xdc   : > { %v2876_v24 = vpop.permute.xlu0 %789  ;;  %1203 = vrot.lane.b32.xlu1 %v2412_v58, %s2187_s18 }
  0xdd   : > { %3875 = vst [vmem:[#allocation24_spill] sm:$0xff] %v2876_v24  ;;  %v2122_v24 = vld [vmem:[%s2284_s27 + $0xa] sm:$0x1] }
  0xde   : > { %1175 = vrot.lane.b32.xlu0 %v2563_v53, %s2186_s17  ;;  %v2882_v49 = vpop.permute.xlu1 %1109 }
  0xdf   : > { %3876 = vst [vmem:[#allocation25_spill] sm:$0xff] %v2882_v49  ;;  %v3212_v49 = vstv %s2000_s23 }
  0xe0   : > { %v2884_v28 = vpop.permute.xlu0 %1081  ;;  %1467 = vrot.lane.b32.xlu1 %v2740_v33, %s2185_s16 }
  0xe1   : > { %3877 = vst [vmem:[#allocation26_spill] sm:$0xff] %v2884_v28  ;;  %v2119_v28 = vld [vmem:[%s2284_s27 + $0x9] sm:$0x1] }
  0xe2   : > { %1439 = vrot.lane.b32.xlu0 %v2794_v35, %s2184_s15  ;;  %v2890_v44 = vpop.permute.xlu1 %1401 }
  0xe3   : > { %3878 = vst [vmem:[#allocation27_spill] sm:$0xff] %v2890_v44 }
  0xe4   : > { %v2892_v40 = vpop.permute.xlu0 %1395  ;;  %829 = vrot.lane.b32.xlu1 %v2746_v48, %s2185_s16 }
  0xe5   : > { %3879 = vst [vmem:[#allocation28_spill] sm:$0xff] %v2892_v40 }
  0xe6   : > { %1495 = vrot.lane.b32.xlu0 %v2582_v60, %s2186_s17  ;;  %v2898_v16 = vpop.permute.xlu1 %763 }
  0xe7   : > { %3880 = vst [vmem:[#allocation29_spill] sm:$0xff] %v2898_v16 }
  0xe8   : > { %v2900_v19 = vpop.permute.xlu0 %1429  ;;  %879 = vrot.lane.b32.xlu1 %v2457_v46, %s2187_s18 }
  0xe9   : > { %3881 = vst [vmem:[#allocation30_spill] sm:$0xff] %v2900_v19 }
  0xea   : > { %857 = vrot.lane.b32.xlu0 %v2618_v52, %s2186_s17  ;;  %v2906_v6 = vpop.permute.xlu1 %819 }
  0xeb   : > { %3882 = vst [vmem:[#allocation31_spill] sm:$0xff] %v2906_v6 }
  0xec   : > { %v2908_v13 = vpop.permute.xlu0 %791  ;;  %913 = vrot.lane.b32.xlu1 %v2442_v37, %s2188_s19 }
  0xed   : > { %3883 = vst [vmem:[#allocation32_spill] sm:$0xff] %v2908_v13 }
  0xee   : > { %885 = vrot.lane.b32.xlu0 %v2465_v1, %s2187_s18  ;;  %v2914_v16 = vpop.permute.xlu1 %1105 }
  0xef   : > { %3884 = vst [vmem:[#allocation33_spill] sm:$0xff] %v2914_v16 }
  0xf0   : > { %v2916_v19 = vpop.permute.xlu0 %1083  ;;  %1177 = vrot.lane.b32.xlu1 %v2629_v36, %s2186_s17 }
  0xf1   : > { %3885 = vst [vmem:[#allocation34_spill] sm:$0xff] %v2916_v19 }
  0xf2   : > { %1149 = vrot.lane.b32.xlu0 %v2754_v50, %s2185_s16  ;;  %v2922_v6 = vpop.permute.xlu1 %1139 }
  0xf3   : > { %3886 = vst [vmem:[#allocation35_spill] sm:$0xff] %v2922_v6 }
  0xf4   : > { %v2924_v13 = vpop.permute.xlu0 %1111  ;;  %1441 = vrot.lane.b32.xlu1 %v2822_v51, %s2184_s15 }
  0xf5   : > { %3887 = vst [vmem:[#allocation36_spill] sm:$0xff] %v2924_v13 }
  0xf6   : > { %1205 = vrot.lane.b32.xlu0 %v2480_v57, %s2187_s18  ;;  %v2930_v44 = vpop.permute.xlu1 %1431 }
  0xf7   : > { %3888 = vst [vmem:[#allocation37_spill] sm:$0xff] %v2930_v44 }
  0xf8   : > { %v2932_v16 = vpop.permute.xlu0 %1403  ;;  %1491 = vrot.lane.b32.xlu1 %v2663_v47, %s2186_s17 }
  0xf9   : > { %3889 = vst [vmem:[#allocation38_spill] sm:$0xff] %v2932_v16 }
  0xfa   : > { %1469 = vrot.lane.b32.xlu0 %v2766_v3, %s2185_s16  ;;  %v2938_v19 = vpop.permute.xlu1 %793 }
  0xfb   : > { %3890 = vst [vmem:[#allocation39_spill] sm:$0xff] %v2938_v19 }
  0xfc   : > { %v2940_v6 = vpop.permute.xlu0 %765  ;;  %1525 = vrot.lane.b32.xlu1 %v2525_v10, %s2187_s18 }
  0xfd   : > { %3891 = vst [vmem:[#allocation40_spill] sm:$0xff] %v2940_v6 }
  0xfe   : > { %1497 = vrot.lane.b32.xlu0 %v2671_v21, %s2186_s17  ;;  %v2946_v13 = vpop.permute.xlu1 %821 }
  0xff   : > { %3892 = vst [vmem:[#allocation41_spill] sm:$0xff] %v2946_v13 }
 0x100   : > { %v2948_v44 = vpop.permute.xlu0 %815  ;;  %887 = vrot.lane.b32.xlu1 %v2545_v9, %s2187_s18 }
 0x101   : > { %3893 = vst [vmem:[#allocation42_spill] sm:$0xff] %v2948_v44 }
 0x102   : > { %859 = vrot.lane.b32.xlu0 %v2702_v61, %s2186_s17  ;;  %v2954_v16 = vpop.permute.xlu1 %1085 }
 0x103   : > { %3894 = vst [vmem:[#allocation43_spill] sm:$0xff] %v2954_v16 }
 0x104   : > { %v2956_v19 = vpop.permute.xlu0 %849  ;;  %1151 = vrot.lane.b32.xlu1 %v2778_v7, %s2185_s16 }
 0x105   : > { %3895 = vst [vmem:[#allocation44_spill] sm:$0xff] %v2956_v19 }
 0x106   : > { %915 = vrot.lane.b32.xlu0 %v2450_v22, %s2188_s19  ;;  %v2962_v6 = vpop.permute.xlu1 %1141 }
 0x107   : > { %3896 = vst [vmem:[#allocation45_spill] sm:$0xff] %v2962_v6 }
 0x108   : > { %v2964_v13 = vpop.permute.xlu0 %1113  ;;  %1201 = vrot.lane.b32.xlu1 %v2561_v11, %s2187_s18 }
 0x109   : > { %3897 = vst [vmem:[#allocation46_spill] sm:$0xff] %v2964_v13 }
 0x10a   : > { %1179 = vrot.lane.b32.xlu0 %v2729_v17, %s2186_s17  ;;  %v2970_v44 = vpop.permute.xlu1 %1427 }
 0x10b   : > { %3898 = vst [vmem:[#allocation47_spill] sm:$0xff] %v2970_v44 }
 0x10c   : > { %v2972_v16 = vpop.permute.xlu0 %1405  ;;  %1235 = vrot.lane.b32.xlu1 %v2412_v58, %s2188_s19 }
 0x10d   : > { %3899 = vst [vmem:[#allocation48_spill] sm:$0xff] %v2972_v16 }
 0x10e   : > { %1207 = vrot.lane.b32.xlu0 %v2563_v53, %s2187_s18  ;;  %v2978_v19 = vpop.permute.xlu1 %1461 }
 0x10f   : > { %3900 = vst [vmem:[#allocation49_spill] sm:$0xff] %v2978_v19 }
 0x110   : > { %v2980_v6 = vpop.permute.xlu0 %1433  ;;  %1499 = vrot.lane.b32.xlu1 %v2740_v33, %s2186_s17 }
 0x111   : > { %3901 = vst [vmem:[#allocation50_spill] sm:$0xff] %v2980_v6 }
 0x112   : > { %1471 = vrot.lane.b32.xlu0 %v2794_v35, %s2185_s16  ;;  %v2986_v13 = vpop.permute.xlu1 %823 }
 0x113   : > { %3902 = vst [vmem:[#allocation51_spill] sm:$0xff] %v2986_v13 }
 0x114   : > { %v2988_v44 = vpop.permute.xlu0 %795  ;;  %861 = vrot.lane.b32.xlu1 %v2746_v48, %s2186_s17 }
 0x115   : > { %3903 = vst [vmem:[#allocation52_spill] sm:$0xff] %v2988_v44 }
 0x116   : > { %1527 = vrot.lane.b32.xlu0 %v2582_v60, %s2187_s18  ;;  %v2994_v16 = vpop.permute.xlu1 %1087 }
 0x117   : > { %3904 = vst [vmem:[#allocation53_spill] sm:$0xff] %v2994_v16 }
 0x118   : > { %v2996_v19 = vpop.permute.xlu0 %851  ;;  %911 = vrot.lane.b32.xlu1 %v2457_v46, %s2188_s19 }
 0x119   : > { %3905 = vst [vmem:[#allocation54_spill] sm:$0xff] %v2996_v19 }
 0x11a   : > { %889 = vrot.lane.b32.xlu0 %v2618_v52, %s2187_s18  ;;  %v3002_v6 = vpop.permute.xlu1 %1137 }
 0x11b   : > { %3906 = vst [vmem:[#allocation55_spill] sm:$0xff] %v3002_v6 }
 0x11c   : > { %v3004_v13 = vpop.permute.xlu0 %1115  ;;  %945 = vrot.lane.b32.xlu1 %v2442_v37, %s2189_s20 }
 0x11d   : > { %3907 = vst [vmem:[#allocation56_spill] sm:$0xff] %v3004_v13 }
 0x11e   : > { %917 = vrot.lane.b32.xlu0 %v2465_v1, %s2188_s19  ;;  %v3010_v16 = vpop.permute.xlu1 %1171 }
 0x11f   : > { %3908 = vst [vmem:[#allocation57_spill] sm:$0xff] %v3010_v16 }
 0x120   : > { %v3012_v19 = vpop.permute.xlu0 %1143  ;;  %1209 = vrot.lane.b32.xlu1 %v2629_v36, %s2187_s18 }
 0x121   : > { %3909 = vst [vmem:[#allocation58_spill] sm:$0xff] %v3012_v19 }
 0x122   : > { %1181 = vrot.lane.b32.xlu0 %v2754_v50, %s2186_s17  ;;  %v3018_v6 = vpop.permute.xlu1 %1435 }
 0x123   : > { %3910 = vst [vmem:[#allocation59_spill] sm:$0xff] %v3018_v6 }
 0x124   : > { %v3020_v13 = vpop.permute.xlu0 %1407  ;;  %1473 = vrot.lane.b32.xlu1 %v2822_v51, %s2185_s16 }
 0x125   : > { %3911 = vst [vmem:[#allocation60_spill] sm:$0xff] %v3020_v13 }
 0x126   : > { %1237 = vrot.lane.b32.xlu0 %v2480_v57, %s2188_s19  ;;  %v3026_v44 = vpop.permute.xlu1 %797 }
 0x127   : > { %3912 = vst [vmem:[#allocation61_spill] sm:$0xff] %v3026_v44 }
 0x128   : > { %v3028_v16 = vpop.permute.xlu0 %1463  ;;  %1523 = vrot.lane.b32.xlu1 %v2663_v47, %s2187_s18 }
 0x129   : > { %3913 = vst [vmem:[#allocation62_spill] sm:$0xff] %v3028_v16 }
 0x12a   : > { %1501 = vrot.lane.b32.xlu0 %v2766_v3, %s2186_s17  ;;  %v3034_v19 = vpop.permute.xlu1 %847 }
 0x12b   : > { %3914 = vst [vmem:[#allocation63_spill] sm:$0xff] %v3034_v19 }
 0x12c   : > { %v3036_v6 = vpop.permute.xlu0 %825  ;;  %1557 = vrot.lane.b32.xlu1 %v2525_v10, %s2188_s19 }
 0x12d   : > { %3915 = vst [vmem:[#allocation64_spill] sm:$0xff] %v3036_v6 }
 0x12e   : > { %1529 = vrot.lane.b32.xlu0 %v2671_v21, %s2187_s18  ;;  %v3042_v13 = vpop.permute.xlu1 %881 }
 0x12f   : > { %3916 = vst [vmem:[#allocation65_spill] sm:$0xff] %v3042_v13 }
 0x130   : > { %v3044_v44 = vpop.permute.xlu0 %853  ;;  %919 = vrot.lane.b32.xlu1 %v2545_v9, %s2188_s19 }
 0x131   : > { %3917 = vst [vmem:[#allocation66_spill] sm:$0xff] %v3044_v44 }
 0x132   : > { %891 = vrot.lane.b32.xlu0 %v2702_v61, %s2187_s18  ;;  %v3050_v16 = vpop.permute.xlu1 %1145 }
 0x133   : > { %3918 = vst [vmem:[#allocation67_spill] sm:$0xff] %v3050_v16 }
 0x134   : > { %v3052_v19 = vpop.permute.xlu0 %1117  ;;  %1183 = vrot.lane.b32.xlu1 %v2778_v7, %s2186_s17 }
 0x135   : > { %3919 = vst [vmem:[#allocation68_spill] sm:$0xff] %v3052_v19 }
 0x136   : > { %947 = vrot.lane.b32.xlu0 %v2450_v22, %s2189_s20  ;;  %v3058_v6 = vpop.permute.xlu1 %1409 }
 0x137   : > { %3920 = vst [vmem:[#allocation69_spill] sm:$0xff] %v3058_v6 }
 0x138   : > { %v3060_v13 = vpop.permute.xlu0 %1173  ;;  %1233 = vrot.lane.b32.xlu1 %v2561_v11, %s2188_s19 }
 0x139   : > { %3921 = vst [vmem:[#allocation70_spill] sm:$0xff] %v3060_v13 }
 0x13a   : > { %1211 = vrot.lane.b32.xlu0 %v2729_v17, %s2187_s18  ;;  %v3066_v44 = vpop.permute.xlu1 %1459 }
 0x13b   : > { %3922 = vst [vmem:[#allocation71_spill] sm:$0xff] %v3066_v44 }
 0x13c   : > { %v3068_v16 = vpop.permute.xlu0 %1437  ;;  %1267 = vrot.lane.b32.xlu1 %v2412_v58, %s2189_s20 }
 0x13d   : > { %3923 = vst [vmem:[#allocation72_spill] sm:$0xff] %v3068_v16 }
 0x13e   : > { %1239 = vrot.lane.b32.xlu0 %v2563_v53, %s2188_s19  ;;  %v3074_v19 = vpop.permute.xlu1 %1493 }
 0x13f   : > { %3924 = vst [vmem:[#allocation73_spill] sm:$0xff] %v3074_v19 }
 0x140   : > { %v3076_v6 = vpop.permute.xlu0 %1465  ;;  %1531 = vrot.lane.b32.xlu1 %v2740_v33, %s2187_s18 }
 0x141   : > { %3925 = vst [vmem:[#allocation74_spill] sm:$0xff] %v3076_v6 }
 0x142   : > { %1503 = vrot.lane.b32.xlu0 %v2794_v35, %s2186_s17  ;;  %v3082_v13 = vpop.permute.xlu1 %855 }
 0x143   : > { %3926 = vst [vmem:[#allocation75_spill] sm:$0xff] %v3082_v13 }
 0x144   : > { %v3084_v44 = vpop.permute.xlu0 %827  ;;  %893 = vrot.lane.b32.xlu1 %v2746_v48, %s2187_s18 }
 0x145   : > { %3927 = vst [vmem:[#allocation76_spill] sm:$0xff] %v3084_v44 }
 0x146   : > { %1559 = vrot.lane.b32.xlu0 %v2582_v60, %s2188_s19  ;;  %v3090_v16 = vpop.permute.xlu1 %1119 }
 0x147   : > { %3928 = vst [vmem:[#allocation77_spill] sm:$0xff] %v3090_v16 }
 0x148   : > { %v3092_v19 = vpop.permute.xlu0 %883  ;;  %943 = vrot.lane.b32.xlu1 %v2457_v46, %s2189_s20 }
 0x149   : > { %3929 = vst [vmem:[#allocation78_spill] sm:$0xff] %v3092_v19 }
 0x14a   : > { %921 = vrot.lane.b32.xlu0 %v2618_v52, %s2188_s19  ;;  %v3098_v6 = vpop.permute.xlu1 %1169 }
 0x14b   : > { %3930 = vst [vmem:[#allocation79_spill] sm:$0xff] %v3098_v6 }
 0x14c   : > { %v3100_v13 = vpop.permute.xlu0 %1147  ;;  %1213 = vrot.lane.b32.xlu1 %v2754_v50, %s2187_s18 }
 0x14d   : > { %3931 = vst [vmem:[#allocation80_spill] sm:$0xff] %v3100_v13 }
 0x14e   : > { %949 = vrot.lane.b32.xlu0 %v2465_v1, %s2189_s20  ;;  %v3106_v44 = vpop.permute.xlu1 %1203 }
 0x14f   : > { %3932 = vst [vmem:[#allocation81_spill] sm:$0xff] %v3106_v44 }
 0x150   : > { %v3108_v16 = vpop.permute.xlu0 %1175  ;;  %1269 = vrot.lane.b32.xlu1 %v2480_v57, %s2189_s20 }
 0x151   : > { %3933 = vst [vmem:[#allocation82_spill] sm:$0xff] %v3108_v16 }
 0x152   : > { %1241 = vrot.lane.b32.xlu0 %v2629_v36, %s2188_s19  ;;  %v3114_v19 = vpop.permute.xlu1 %1467 }
 0x153   : > { %3934 = vst [vmem:[#allocation83_spill] sm:$0xff] %v3114_v19 }
 0x154   : > { %v3116_v6 = vpop.permute.xlu0 %1439  ;;  %1533 = vrot.lane.b32.xlu1 %v2766_v3, %s2187_s18 }
 0x155   : > { %3935 = vst [vmem:[#allocation84_spill] sm:$0xff] %v3116_v6 }
 0x156   : > { %1505 = vrot.lane.b32.xlu0 %v2822_v51, %s2186_s17  ;;  %v3122_v13 = vpop.permute.xlu1 %829 }
 0x157   : > { %3936 = vst [vmem:[#allocation85_spill] sm:$0xff] %v3122_v13 }
 0x158   : > { %v3124_v44 = vpop.permute.xlu0 %1495  ;;  %1561 = vrot.lane.b32.xlu1 %v2671_v21, %s2188_s19 }
 0x159   : > { %3937 = vst [vmem:[#allocation86_spill] sm:$0xff] %v3124_v44 }
 0x15a   : > { %1555 = vrot.lane.b32.xlu0 %v2663_v47, %s2188_s19  ;;  %v3130_v16 = vpop.permute.xlu1 %879 }
 0x15b   : > { %3938 = vst [vmem:[#allocation87_spill] sm:$0xff] %v3130_v16 }
 0x15c   : > { %v3132_v19 = vpop.permute.xlu0 %857  ;;  %923 = vrot.lane.b32.xlu1 %v2702_v61, %s2188_s19 }
 0x15d   : > { %3939 = vst [vmem:[#allocation88_spill] sm:$0xff] %v3132_v19 }
 0x15e   : > { %1589 = vrot.lane.b32.xlu0 %v2525_v10, %s2189_s20  ;;  %v3138_v6 = vpop.permute.xlu1 %913 }
 0x15f   : > { %3940 = vst [vmem:[#allocation89_spill] sm:$0xff] %v3138_v6 }
 0x160   : > { %v3140_v13 = vpop.permute.xlu0 %885  ;;  %1215 = vrot.lane.b32.xlu1 %v2778_v7, %s2187_s18 }
 0x161   : > { %3941 = vst [vmem:[#allocation90_spill] sm:$0xff] %v3140_v13 }
 0x162   : > { %951 = vrot.lane.b32.xlu0 %v2545_v9, %s2189_s20  ;;  %v3146_v44 = vpop.permute.xlu1 %1177 }
 0x163   : > { %3942 = vst [vmem:[#allocation91_spill] sm:$0xff] %v3146_v44 }
 0x164   : > { %v3148_v16 = vpop.permute.xlu0 %1149  ;;  %1265 = vrot.lane.b32.xlu1 %v2561_v11, %s2189_s20 }
 0x165   : > { %3943 = vst [vmem:[#allocation92_spill] sm:$0xff] %v3148_v16 }
 0x166   : > { %1243 = vrot.lane.b32.xlu0 %v2729_v17, %s2188_s19  ;;  %v3154_v19 = vpop.permute.xlu1 %1441 }
 0x167   : > { %3944 = vst [vmem:[#allocation93_spill] sm:$0xff] %v3154_v19 }
 0x168   : > { %v3156_v6 = vpop.permute.xlu0 %1205  ;;  %1535 = vrot.lane.b32.xlu1 %v2794_v35, %s2187_s18 }
 0x169   : > { %3945 = vst [vmem:[#allocation94_spill] sm:$0xff] %v3156_v6 }
 0x16a   : > { %1271 = vrot.lane.b32.xlu0 %v2563_v53, %s2189_s20  ;;  %v3162_v13 = vpop.permute.xlu1 %1491 }
 0x16b   : > { %3946 = vst [vmem:[#allocation95_spill] sm:$0xff] %v3162_v13 }
 0x16c   : > { %v3164_v44 = vpop.permute.xlu0 %1469  ;;  %1591 = vrot.lane.b32.xlu1 %v2582_v60, %s2189_s20 }
 0x16d   : > { %3947 = vst [vmem:[#allocation96_spill] sm:$0xff] %v3164_v44  ;;  %v3198_v44 = vstv %s1999_s22 }
 0x16e   : > { %1563 = vrot.lane.b32.xlu0 %v2740_v33, %s2188_s19  ;;  %v3170_v16 = vpop.permute.xlu1 %1525 }
 0x16f   : > { %3948 = vst [vmem:[#allocation97_spill] sm:$0xff] %v3170_v16 }
 0x170   : > { %v3172_v19 = vpop.permute.xlu0 %1497  ;;  %953 = vrot.lane.b32.xlu1 %v2618_v52, %s2189_s20  ;;  %v2123_v52 = vld [vmem:[%s2284_s27 + $0xc] sm:$0x1] }
 0x171   : > { %3949 = vst [vmem:[#allocation98_spill] sm:$0xff] %v3172_v19 }
 0x172   : > { %925 = vrot.lane.b32.xlu0 %v2746_v48, %s2188_s19  ;;  %v3178_v6 = vpop.permute.xlu1 %887 }
 0x173   : > { %3950 = vst [vmem:[#allocation99_spill] sm:$0xff] %v3178_v6 }
 0x174   : > { %v3180_v13 = vpop.permute.xlu0 %859  ;;  %1273 = vrot.lane.b32.xlu1 %v2629_v36, %s2189_s20  ;;  %v353_v36 = vmul.f32 %v2119_v28, %v3198_v44 }
 0x175   : > { %3951 = vst [vmem:[#allocation100_spill] sm:$0xff] %v3180_v13  ;;  %v3196_v13 = vstv %s339_s21 }
 0x176   : > { %1245 = vrot.lane.b32.xlu0 %v2754_v50, %s2188_s19  ;;  %v3186_v16 = vpop.permute.xlu1 %1151 }
 0x177   : > { %3952 = vst [vmem:[#allocation101_spill] sm:$0xff] %v3186_v16 }
 0x178   : > { %v3188_v19 = vpop.permute.xlu0 %915  ;;  %1565 = vrot.lane.b32.xlu1 %v2766_v3, %s2188_s19 }
 0x179   : > { %3953 = vst [vmem:[#allocation102_spill] sm:$0xff] %v3188_v19  ;;  %v2118_v19 = vld [vmem:[%s2284_s27 + $0x8] sm:$0x1] }
 0x17a   : > { %1537 = vrot.lane.b32.xlu0 %v2822_v51, %s2187_s18  ;;  %v3194_v6 = vpop.permute.xlu1 %1201 }
 0x17b   : > { %3954 = vst [vmem:[#allocation103_spill] sm:$0xff] %v3194_v6  ;;  %v343_v6 = vmul.f32 %v2118_v19, %v3196_v13 }
 0x17c   : > { %v3200_v40 = vpop.permute.xlu0 %1179  ;;  %1593 = vrot.lane.b32.xlu1 %v2671_v21, %s2189_s20  ;;  %v2120_v21 = vld [vmem:[%s2284_s27 + $0x4] sm:$0x1] }
 0x17d   : > { %3955 = vst [vmem:[#allocation104_spill] sm:$0xff] %v3200_v40  ;;  %v361_v28 = vadd.f32 %v353_v36, %v343_v6 }
 0x17e   : > { %1587 = vrot.lane.b32.xlu0 %v2663_v47, %s2189_s20  ;;  %v3206_v16 = vpop.permute.xlu1 %1235  ;;  %v342_v47 = vmul.f32 %v2120_v21, %v3196_v13  ;;  %v344_v21 = vmul.f32 %v2123_v52, %v3196_v13 }
 0x17f   : > { %3956 = vst [vmem:[#allocation105_spill] sm:$0xff] %v3206_v16  ;;  %v352_v16 = vmul.f32 %v2121_v27, %v3198_v44  ;;  %v354_v27 = vmul.f32 %v2124_v56, %v3198_v44 }
 0x180   : > { %v3214_v40 = vpop.permute.xlu0 %1207  ;;  %1247 = vrot.lane.b32.xlu1 %v2778_v7, %s2188_s19 }
 0x181   : > { %3957 = vst [vmem:[#allocation106_spill] sm:$0xff] %v3214_v40  ;;  %v371_v40 = vmul.f32 %v2122_v24, %v3212_v49  ;;  %v360_v36 = vadd.f32 %v352_v16, %v342_v47  ;;  %v2125_v24 = vld [vmem:[%s2284_s27 + $0x6] sm:$0x1]  ;;  %v351_v47 = vmul.f32 %v2128_v23, %v3198_v44  ;;  %v362_v16 = vadd.f32 %v354_v27, %v344_v21  ;;  %v2130_v23 = vld [vmem:[%s2284_s27 + $0x7] sm:$0x1] }
 0x182   : > { %955 = vrot.lane.b32.xlu0 %v2702_v61, %s2189_s20  ;;  %v3224_v19 = vpop.permute.xlu1 %1499  ;;  %v370_v6 = vmul.f32 %v2125_v24, %v3212_v49  ;;  %v2126_v61 = vld [vmem:[%s2284_s27 + $0xb] sm:$0x1]  ;;  %v372_v24 = vmul.f32 %v2129_v41, %v3212_v49  ;;  %v388_v41 = vmul.f32 %v2130_v23, %v3228_v34  ;;  %v2131_v27 = vld [vmem:[%s2284_s27 + $0x2] sm:$0x1] }
 0x183   : > { %3958 = vst [vmem:[#allocation107_spill] sm:$0xff] %v3224_v19  ;;  %v379_v19 = vadd.f32 %v371_v40, %v361_v28  ;;  %v389_v56 = vmul.f32 %v2126_v61, %v3228_v34  ;;  %v355_v40 = vmul.f32 %v3198_v44, %v2434_v30  ;;  %v369_v30 = vmul.f32 %v2131_v27, %v3212_v49  ;;  %v2134_v27 = vld [vmem:[%s2284_s27 + $0x13] sm:$0x1] }
 0x184   : > { %v3234_v63 = vpop.permute.xlu0 %1471  ;;  %1567 = vrot.lane.b32.xlu1 %v2794_v35, %s2188_s19  ;;  %v378_v61 = vadd.f32 %v370_v6, %v360_v36  ;;  %v373_v6 = vmul.f32 %v3212_v49, %v2437_v32 }
 0x185   : > { %3959 = vst [vmem:[#allocation108_spill] sm:$0xff] %v3234_v63  ;;  %v2127_v63 = vld [vmem:[%s2284_s27] sm:$0x1]  ;;  %v397_v21 = vadd.f32 %v389_v56, %v379_v19  ;;  %v3279_v19 = vstv %s3238_s28  ;;  %v356_v56 = vmul.f32 %v3198_v44, %v2511_v0 }
 0x186   : > { %1275 = vrot.lane.b32.xlu0 %v2729_v17, %s2189_s20  ;;  %v3244_v52 = vpop.permute.xlu1 %861  ;;  %v341_v60 = vmul.f32 %v2127_v63, %v3196_v13  ;;  %v2132_v17 = vld [vmem:[%s2284_s27 + $0xf] sm:$0x1] }
 0x187   : > { %3960 = vst [vmem:[#allocation109_spill] sm:$0xff] %v3244_v52  ;;  %v345_v52 = vmul.f32 %v3196_v13, %v2428_v25 }
 0x188   : > { %v3258_v28 = vpop.permute.xlu0 %1527  ;;  %957 = vrot.lane.b32.xlu1 %v2746_v48, %s2189_s20  ;;  %v359_v25 = vadd.f32 %v351_v47, %v341_v60  ;;  %v390_v48 = vmul.f32 %v2132_v17, %v3228_v34  ;;  %v346_v60 = vmul.f32 %v3196_v13, %v2501_v15  ;;  %v2133_v47 = vld [vmem:[%s2284_s27 + $0x3] sm:$0x1]  ;;  %v391_v15 = vmul.f32 %v2134_v27, %v3228_v34 }
 0x189   : > { %3961 = vst [vmem:[#allocation110_spill] sm:$0xff] %v3258_v28  ;;  %v380_v28 = vadd.f32 %v372_v24, %v362_v16  ;;  %v363_v36 = vadd.f32 %v355_v40, %v345_v52  ;;  %v396_v52 = vadd.f32 %v388_v41, %v378_v61  ;;  %v387_v16 = vmul.f32 %v2133_v47, %v3228_v34 }
 0x18a   : > { %1595 = vrot.lane.b32.xlu0 %v2740_v33, %s2189_s20  ;;  %v3264_v63 = vpop.permute.xlu1 %911  ;;  %v377_v32 = vadd.f32 %v369_v30, %v359_v25  ;;  %v407_v24 = vadd.f32 %v3279_v19, %v397_v21  ;;  %v364_v0 = vadd.f32 %v356_v56, %v346_v60  ;;  %v347_v60 = vmul.f32 %v3196_v13, %v2566_v4 }
 0x18b   : > { %3962 = vst [vmem:[#allocation111_spill] sm:$0xff] %v3264_v63  ;;  %v398_v40 = vadd.f32 %v390_v48, %v380_v28  ;;  %v381_v23 = vadd.f32 %v373_v6, %v363_v36  ;;  %v3964_v63 = vld [vmem:[#allocation8_spill] sm:$0xff]  ;;  %v406_v48 = vadd.f32 %v3279_v19, %v396_v52  ;;  %v357_v56 = vmul.f32 %v3198_v44, %v2569_v14 }
 0x18c   : > { %v3274_v33 = vpop.permute.xlu0 %889  ;;  %1569 = vrot.lane.b32.xlu1 %v2822_v51, %s2188_s19  ;;  %v374_v61 = vmul.f32 %v3212_v49, %v3964_v63  ;;  %v395_v28 = vadd.f32 %v387_v16, %v377_v32  ;;  %v3305_v21 = vmax.f32 %v407_v24, 0.0  ;;  %v392_v63 = vmul.f32 %v3228_v34, %v2521_v2 }
 0x18d   : > { %3963 = vst [vmem:[#allocation112_spill] sm:$0xff] %v3274_v33  ;;  %v408_v25 = vadd.f32 %v3279_v19, %v398_v40  ;;  %v399_v30 = vadd.f32 %v391_v15, %v381_v23  ;;  %v3322_v32 = vmax.f32 %v406_v48, 0.0  ;;  %v365_v14 = vadd.f32 %v357_v56, %v347_v60 }
 0x18e   : > { %1277 = vrot.lane.b32.xlu0 %v2754_v50, %s2189_s20  ;;  %v3287_v17 = vpop.permute.xlu1 %945  ;;  %v382_v6 = vadd.f32 %v374_v61, %v364_v0  ;;  %v405_v47 = vadd.f32 %v3279_v19, %v395_v28  ;;  %v375_v40 = vmul.f32 %v3212_v49, %v2580_v59  ;;  %v393_v59 = vmul.f32 %v3228_v34, %v2600_v8 }
 0x18f   : > { %v3325_v16 = vmax.f32 %v408_v25, 0.0  ;;  %v409_v2 = vadd.f32 %v3279_v19, %v399_v30  ;;  %v348_v25 = vmul.f32 %v3196_v13, %v2604_v29  ;;  %v358_v30 = vmul.f32 %v3198_v44, %v2609_v26 }
 0x190   : > { %v3294_v33 = vpop.permute.xlu0 %917  ;;  %1279 = vrot.lane.b32.xlu1 %v2778_v7, %s2189_s20  ;;  %v400_v4 = vadd.f32 %v392_v63, %v382_v6  ;;  %v3338_v27 = vmax.f32 %v405_v47, 0.0  ;;  %v383_v48 = vadd.f32 %v375_v40, %v365_v14  ;;  %v376_v29 = vmul.f32 %v3212_v49, %v2612_v42 }
 0x191   : > { %v3344_v0 = vmax.f32 %v409_v2, 0.0  ;;  %v366_v56 = vadd.f32 %v358_v30, %v348_v25  ;;  %v394_v2 = vmul.f32 %v3228_v34, %v2625_v20 }
 0x192   : > { %1597 = vrot.lane.b32.xlu0 %v2766_v3, %s2189_s20  ;;  %v3302_v41 = vpop.permute.xlu1 %1209  ;;  %v410_v61 = vadd.f32 %v3279_v19, %v400_v4  ;;  %v401_v60 = vadd.f32 %v393_v59, %v383_v48 }
 0x193   : > { %v384_v47 = vadd.f32 %v376_v29, %v366_v56 }
 0x194   : > { %v3308_v36 = vpop.permute.xlu0 %1181  ;;  %1601 = vrot.lane.b32.xlu1 %v2822_v51, %s2189_s20  ;;  %v3361_v63 = vmax.f32 %v410_v61, 0.0  ;;  %v411_v26 = vadd.f32 %v3279_v19, %v401_v60 }
 0x195   : > { %v402_v14 = vadd.f32 %v394_v2, %v384_v47 }
 0x196   : > { %1599 = vrot.lane.b32.xlu0 %v2794_v35, %s2189_s20  ;;  %v3320_v52 = vpop.permute.xlu1 %1473  ;;  %v3384_v42 = vmax.f32 %v411_v26, 0.0 }
 0x197   : > { %v412_v34 = vadd.f32 %v3279_v19, %v402_v14 }
 0x198   : > { %v3327_v24 = vpop.permute.xlu0 %1237  ;;  %433 = vrot.lane.b32.xlu1 %v3305_v21, %s2183_s14 }
 0x199   : > { %v3407_v59 = vmax.f32 %v412_v34, 0.0 }
 0x19a   : > { %431 = vrot.lane.b32.xlu0 %v3322_v32, %s2183_s14  ;;  %v3336_v23 = vpop.permute.xlu1 %1523 }
 0x19c   : > { %v3340_v15 = vpop.permute.xlu0 %1501  ;;  %435 = vrot.lane.b32.xlu1 %v3325_v16, %s2183_s14 }
 0x19e   : > { %429 = vrot.lane.b32.xlu0 %v3338_v27, %s2183_s14  ;;  %v3351_v28 = vpop.permute.xlu1 %1557 }
 0x19f   : > { %3965 = vst [vmem:[#allocation8_spill] sm:$0xff] %v3351_v28 }
 0x1a0   : > { %v3357_v6 = vpop.permute.xlu0 %1529  ;;  %437 = vrot.lane.b32.xlu1 %v3344_v0, %s2183_s14 }
 0x1a1   : > { %3966 = vst [vmem:[#allocation113_spill] sm:$0xff] %v3357_v6 }
 0x1a2   : > { %463 = vrot.lane.b32.xlu0 %v3322_v32, %s2184_s15  ;;  %v3365_v8 = vpop.permute.xlu1 %919 }
 0x1a4   : > { %v3369_v13 = vpop.permute.xlu0 %891  ;;  %439 = vrot.lane.b32.xlu1 %v3361_v63, %s2183_s14 }
 0x1a5   : > { %3967 = vst [vmem:[#allocation114_spill] sm:$0xff] %v3369_v13 }
 0x1a6   : > { %465 = vrot.lane.b32.xlu0 %v3305_v21, %s2184_s15  ;;  %v3376_v44 = vpop.permute.xlu1 %1183 }
 0x1a7   : > { %3968 = vst [vmem:[#allocation115_spill] sm:$0xff] %v3376_v44  ;;  %v4004_v44 = vld [vmem:[#allocation29_spill] sm:$0xff] }
 0x1a8   : > { %v3380_v4 = vpop.permute.xlu0 %947  ;;  %467 = vrot.lane.b32.xlu1 %v3325_v16, %s2184_s15 }
 0x1aa   : > { %461 = vrot.lane.b32.xlu0 %v3338_v27, %s2184_s15  ;;  %v3388_v49 = vpop.permute.xlu1 %1233 }
 0x1ab   : > { %3969 = vst [vmem:[#allocation116_spill] sm:$0xff] %v3388_v49 }
 0x1ac   : > { %v3390_v40 = vpop.permute.xlu0 %1211  ;;  %441 = vrot.lane.b32.xlu1 %v3384_v42, %s2183_s14 }
 0x1ad   : > { %3970 = vst [vmem:[#allocation117_spill] sm:$0xff] %v3390_v40  ;;  %v4003_v40 = vld [vmem:[#allocation14_spill] sm:$0xff] }
 0x1ae   : > { %495 = vrot.lane.b32.xlu0 %v3322_v32, %s2185_s16  ;;  %v3396_v20 = vpop.permute.xlu1 %1267  ;;  %v781_v13 = vadd.f32 %v4004_v44, %v4003_v40  ;;  %v4014_v40 = vld [vmem:[#allocation37_spill] sm:$0xff] }
 0x1b0   : > { %v3399_v61 = vpop.permute.xlu0 %1239  ;;  %497 = vrot.lane.b32.xlu1 %v3305_v21, %s2185_s16 }
 0x1b1   : > { %3971 = vst [vmem:[#allocation118_spill] sm:$0xff] %v3399_v61 }
 0x1b2   : > { %469 = vrot.lane.b32.xlu0 %v3344_v0, %s2184_s15  ;;  %v3405_v48 = vpop.permute.xlu1 %1531 }
 0x1b3   : > { %3972 = vst [vmem:[#allocation119_spill] sm:$0xff] %v3405_v48 }
 0x1b4   : > { %v3409_v25 = vpop.permute.xlu0 %1503  ;;  %471 = vrot.lane.b32.xlu1 %v3361_v63, %s2184_s15 }
 0x1b5   : > { %3973 = vst [vmem:[#allocation120_spill] sm:$0xff] %v3409_v25 }
 0x1b6   : > { %443 = vrot.lane.b32.xlu0 %v3407_v59, %s2183_s14  ;;  %v3415_v19 = vpop.permute.xlu1 %893 }
 0x1b7   : > { %3974 = vst [vmem:[#allocation121_spill] sm:$0xff] %v3415_v19  ;;  %v775_v19 = vadd.f32 %v2816_v38, %v2457_v46 }
 0x1b8   : > { %v3417_v30 = vpop.permute.xlu0 %1559  ;;  %499 = vrot.lane.b32.xlu1 %v3325_v16, %s2185_s16 }
 0x1b9   : > { %3975 = vst [vmem:[#allocation122_spill] sm:$0xff] %v3417_v30 }
 0x1ba   : > { %493 = vrot.lane.b32.xlu0 %v3338_v27, %s2185_s16  ;;  %v3423_v60 = vpop.permute.xlu1 %943 }
 0x1bc   : > { %v3425_v56 = vpop.permute.xlu0 %921  ;;  %473 = vrot.lane.b32.xlu1 %v3384_v42, %s2184_s15 }
 0x1bd   : > { %3976 = vst [vmem:[#allocation123_spill] sm:$0xff] %v3425_v56 }
 0x1be   : > { %527 = vrot.lane.b32.xlu0 %v3322_v32, %s2186_s17  ;;  %v3431_v29 = vpop.permute.xlu1 %1213 }
 0x1bf   : > { %3977 = vst [vmem:[#allocation124_spill] sm:$0xff] %v3431_v29 }
 0x1c0   : > { %v3433_v26 = vpop.permute.xlu0 %949  ;;  %529 = vrot.lane.b32.xlu1 %v3305_v21, %s2186_s17 }
 0x1c2   : > { %501 = vrot.lane.b32.xlu0 %v3344_v0, %s2185_s16  ;;  %v3439_v47 = vpop.permute.xlu1 %1269 }
 0x1c4   : > { %v3441_v2 = vpop.permute.xlu0 %1241  ;;  %503 = vrot.lane.b32.xlu1 %v3361_v63, %s2185_s16 }
 0x1c5   : > { %3978 = vst [vmem:[#allocation125_spill] sm:$0xff] %v3441_v2 }
 0x1c6   : > { %475 = vrot.lane.b32.xlu0 %v3407_v59, %s2184_s15  ;;  %v3447_v14 = vpop.permute.xlu1 %1533  ;;  %s2194_s15 = smov 12  }
 0x1c7   : > { %3979 = vst [vmem:[#allocation126_spill] sm:$0xff] %v3447_v14 }
 0x1c8   : > { %v3449_v34 = vpop.permute.xlu0 %1505  ;;  %531 = vrot.lane.b32.xlu1 %v3325_v16, %s2186_s17 }
 0x1c9   : > { %3980 = vst [vmem:[#allocation127_spill] sm:$0xff] %v3449_v34  ;;  %v776_v34 = vadd.f32 %v2810_v12, %v2442_v37  ;;  %v1420_v37 = vadd.f32 %v2834_v31, %v2525_v10  ;;  %v3987_v10 = vld [vmem:[#allocation20_spill] sm:$0xff] }
 0x1ca   : > { %525 = vrot.lane.b32.xlu0 %v3338_v27, %s2186_s17  ;;  %v3455_v29 = vpop.permute.xlu1 %1561 }
 0x1cb   : > { %3981 = vst [vmem:[#allocation128_spill] sm:$0xff] %v3455_v29  ;;  %v1098_v29 = vadd.f32 %v2806_v45, %v2412_v58  ;;  %v808_v30 = vadd.f32 %v2826_v54, %v776_v34  ;;  %v1099_v58 = vadd.f32 %v2836_v5, %v2480_v57  ;;  %v3986_v45 = vld [vmem:[#allocation18_spill] sm:$0xff]  ;;  %v3988_v54 = vld [vmem:[#allocation9_spill] sm:$0xff] }
 0x1cc   : > { %v3457_v56 = vpop.permute.xlu0 %1555  ;;  %505 = vrot.lane.b32.xlu1 %v3384_v42, %s2185_s16  ;;  %v1097_v38 = vadd.f32 %v3986_v45, %v2561_v11  ;;  %v3990_v34 = vld [vmem:[#allocation21_spill] sm:$0xff]  ;;  %v3992_v57 = vld [vmem:[#allocation10_spill] sm:$0xff] }
 0x1cd   : > { %3982 = vst [vmem:[#allocation129_spill] sm:$0xff] %v3457_v56  ;;  %v777_v56 = vadd.f32 %v2818_v39, %v2450_v22  ;;  %v779_v22 = vadd.f32 %v2844_v43, %v2545_v9  ;;  %v1130_v39 = vadd.f32 %v3987_v10, %v1098_v29  ;;  %v3993_v9 = vld [vmem:[#allocation22_spill] sm:$0xff]  ;;  %v3995_v43 = vld [vmem:[#allocation23_spill] sm:$0xff]  ;;  %v3996_v11 = vld [vmem:[#allocation25_spill] sm:$0xff] }
 0x1ce   : > { %559 = vrot.lane.b32.xlu0 %v3322_v32, %s2187_s18  ;;  %v3463_v2 = vpop.permute.xlu1 %923  ;;  %v780_v5 = vadd.f32 %v3993_v9, %v3992_v57  ;;  %v3997_v29 = vld [vmem:[#allocation11_spill] sm:$0xff]  ;;  %v3998_v45 = vld [vmem:[#allocation26_spill] sm:$0xff] }
 0x1cf   : > { %3983 = vst [vmem:[#allocation130_spill] sm:$0xff] %v3463_v2  ;;  %v778_v2 = vadd.f32 %v2828_v55, %v2465_v1  ;;  %v809_v46 = vadd.f32 %v2842_v18, %v777_v56  ;;  %v1100_v1 = vadd.f32 %v2850_v62, %v2563_v53  ;;  %v3989_v55 = vld [vmem:[#allocation19_spill] sm:$0xff]  ;;  %v3994_v18 = vld [vmem:[#allocation24_spill] sm:$0xff]  ;;  %v840_v62 = vadd.f32 %v3995_v43, %v808_v30  ;;  %v4006_v30 = vld [vmem:[#allocation30_spill] sm:$0xff] }
 0x1d0   : > { %v3467_v14 = vpop.permute.xlu0 %1589  ;;  %561 = vrot.lane.b32.xlu1 %v3305_v21, %s2187_s18  ;;  %v1421_v31 = vadd.f32 %v3989_v55, %v3988_v54  ;;  %v1131_v56 = vadd.f32 %v3996_v11, %v1099_v58  ;;  %v1101_v10 = vadd.f32 %v3998_v45, %v3997_v29  ;;  %v3999_v54 = vld [vmem:[#allocation12_spill] sm:$0xff]  ;;  %v1452_v57 = vadd.f32 %v4006_v30, %v1420_v37  ;;  %v4009_v11 = vld [vmem:[#allocation33_spill] sm:$0xff]  ;;  %v4010_v45 = vld [vmem:[#allocation15_spill] sm:$0xff] }
 0x1d1   : > { %3984 = vst [vmem:[#allocation131_spill] sm:$0xff] %v3467_v14  ;;  %v810_v53 = vadd.f32 %v3994_v18, %v778_v2  ;;  %v4000_v55 = vld [vmem:[#allocation28_spill] sm:$0xff]  ;;  %v4002_v14 = vld [vmem:[#allocation27_spill] sm:$0xff]  ;;  %v1129_v29 = vadd.f32 %v4009_v11, %v1097_v38 }
 0x1d2   : > { %533 = vrot.lane.b32.xlu0 %v3344_v0, %s2186_s17  ;;  %v3484_v12 = vpop.permute.xlu1 %1215  ;;  %v4007_v58 = vld [vmem:[#allocation32_spill] sm:$0xff]  ;;  %v4008_v18 = vld [vmem:[#allocation31_spill] sm:$0xff]  ;;  %v1453_v61 = vadd.f32 %v4014_v40, %v1421_v31 }
 0x1d3   : > { %3985 = vst [vmem:[#allocation132_spill] sm:$0xff] %v3484_v12  ;;  %v807_v12 = vadd.f32 %v3990_v34, %v775_v19  ;;  %v1419_v19 = vadd.f32 %v4000_v55, %v3999_v54  ;;  %v4001_v34 = vld [vmem:[#allocation13_spill] sm:$0xff]  ;;  %v811_v9 = vadd.f32 %v4007_v58, %v779_v22  ;;  %v841_v43 = vadd.f32 %v4008_v18, %v809_v46  ;;  %v4011_v54 = vld [vmem:[#allocation34_spill] sm:$0xff]  ;;  %v4016_v37 = vld [vmem:[#allocation16_spill] sm:$0xff] }
 0x1d4   : > { %v3499_v25 = vpop.permute.xlu0 %951  ;;  %535 = vrot.lane.b32.xlu1 %v3361_v63, %s2186_s17  ;;  %v1422_v48 = vadd.f32 %v4002_v14, %v4001_v34  ;;  %v1102_v55 = vadd.f32 %v4011_v54, %v4010_v45  ;;  %v4012_v14 = vld [vmem:[#allocation36_spill] sm:$0xff]  ;;  %v4017_v22 = vld [vmem:[#allocation38_spill] sm:$0xff]  ;;  %v4018_v46 = vld [vmem:[#allocation17_spill] sm:$0xff] }
 0x1d5   : > { %3991 = vst [vmem:[#allocation18_spill] sm:$0xff] %v3499_v25  ;;  %v1132_v34 = vadd.f32 %v4012_v14, %v1100_v1  ;;  %v4013_v25 = vld [vmem:[#allocation35_spill] sm:$0xff]  ;;  %v1423_v30 = vadd.f32 %v4017_v22, %v4016_v37  ;;  %v4019_v58 = vld [vmem:[#allocation40_spill] sm:$0xff]  ;;  %v4021_v45 = vld [vmem:[#allocation41_spill] sm:$0xff] }
 0x1d6   : > { %507 = vrot.lane.b32.xlu0 %v3407_v59, %s2185_s16  ;;  %v3518_v2 = vpop.permute.xlu1 %1265  ;;  %v1162_v44 = vadd.f32 %v4013_v25, %v1130_v39  ;;  %v782_v38 = vadd.f32 %v4019_v58, %v4018_v46  ;;  %v4020_v18 = vld [vmem:[#allocation39_spill] sm:$0xff]  ;;  %v842_v54 = vadd.f32 %v4021_v45, %v810_v53  ;;  %v4022_v1 = vld [vmem:[#allocation42_spill] sm:$0xff]  ;;  %v4023_v25 = vld [vmem:[#allocation44_spill] sm:$0xff] }
 0x1d7   : > { %4005 = vst [vmem:[#allocation20_spill] sm:$0xff] %v3518_v2  ;;  %v812_v11 = vadd.f32 %v4020_v18, %v780_v5  ;;  %v839_v14 = vadd.f32 %v4022_v1, %v807_v12  ;;  %v872_v39 = vadd.f32 %v4023_v25, %v840_v62  ;;  %v4024_v31 = vld [vmem:[#allocation43_spill] sm:$0xff]  ;;  %v4027_v22 = vld [vmem:[#allocation46_spill] sm:$0xff]  ;;  %v4028_v5 = vld [vmem:[#allocation48_spill] sm:$0xff] }
 0x1d8   : > { %v3529_v49 = vpop.permute.xlu0 %1243  ;;  %563 = vrot.lane.b32.xlu1 %v3325_v16, %s2187_s18  ;;  %v1103_v40 = vadd.f32 %v4024_v31, %v2754_v50  ;;  %v1133_v46 = vadd.f32 %v4027_v22, %v1101_v10  ;;  %v1424_v58 = vadd.f32 %v4028_v5, %v2766_v3  ;;  %v4029_v53 = vld [vmem:[#allocation47_spill] sm:$0xff]  ;;  %v4030_v12 = vld [vmem:[#allocation49_spill] sm:$0xff]  ;;  %v4031_v62 = vld [vmem:[#allocation50_spill] sm:$0xff] }
 0x1d9   : > { %4015 = vst [vmem:[#allocation9_spill] sm:$0xff] %v3529_v49  ;;  %v4025_v49 = vld [vmem:[#allocation45_spill] sm:$0xff]  ;;  %v1451_v18 = vadd.f32 %v4029_v53, %v1419_v19  ;;  %v1484_v45 = vadd.f32 %v4030_v12, %v1452_v57  ;;  %v1454_v1 = vadd.f32 %v4031_v62, %v1422_v48  ;;  %v4032_v25 = vld [vmem:[#allocation52_spill] sm:$0xff]  ;;  %v4033_v31 = vld [vmem:[#allocation51_spill] sm:$0xff] }
 0x1da   : > { %v1163_v2 = vadd.f32 %v4025_v49, %v1131_v56  ;;  %557 = vrot.lane.b32.xlu0 %v3338_v27, %s2187_s18  ;;  %v3546_v37 = vpop.permute.xlu1 %1535  ;;  %v813_v50 = vadd.f32 %v4032_v25, %v781_v13  ;;  %v843_v49 = vadd.f32 %v4033_v31, %v811_v9  ;;  %v4034_v56 = vld [vmem:[#allocation53_spill] sm:$0xff]  ;;  %v4036_v10 = vld [vmem:[#allocation54_spill] sm:$0xff]  ;;  %v4037_v22 = vld [vmem:[#allocation56_spill] sm:$0xff] }
 0x1db   : > { %4026 = vst [vmem:[#allocation19_spill] sm:$0xff] %v3546_v37  ;;  %v1104_v6 = vadd.f32 %v4034_v56, %v2778_v7  ;;  %v873_v3 = vadd.f32 %v4036_v10, %v841_v43  ;;  %v1134_v19 = vadd.f32 %v4037_v22, %v1102_v55  ;;  %v4038_v5 = vld [vmem:[#allocation55_spill] sm:$0xff]  ;;  %v4039_v53 = vld [vmem:[#allocation57_spill] sm:$0xff]  ;;  %v4040_v12 = vld [vmem:[#allocation58_spill] sm:$0xff] }
 0x1dc   : > { %v3558_v28 = vpop.permute.xlu0 %1271  ;;  %537 = vrot.lane.b32.xlu1 %v3384_v42, %s2186_s17  ;;  %v1161_v57 = vadd.f32 %v4038_v5, %v1129_v29  ;;  %v1194_v48 = vadd.f32 %v4039_v53, %v1162_v44  ;;  %v1164_v13 = vadd.f32 %v4040_v12, %v1132_v34  ;;  %v4041_v9 = vld [vmem:[#allocation60_spill] sm:$0xff]  ;;  %v4042_v25 = vld [vmem:[#allocation59_spill] sm:$0xff]  ;;  %v4043_v31 = vld [vmem:[#allocation61_spill] sm:$0xff] }
 0x1dd   : > { %4035 = vst [vmem:[#allocation21_spill] sm:$0xff] %v3558_v28  ;;  %v1425_v62 = vadd.f32 %v4041_v9, %v2794_v35  ;;  %v1455_v7 = vadd.f32 %v4042_v25, %v1423_v30  ;;  %v814_v56 = vadd.f32 %v4043_v31, %v782_v38  ;;  %v4045_v43 = vld [vmem:[#allocation62_spill] sm:$0xff]  ;;  %v4046_v10 = vld [vmem:[#allocation64_spill] sm:$0xff]  ;;  %v4047_v22 = vld [vmem:[#allocation63_spill] sm:$0xff] }
 0x1de   : > { %591 = vrot.lane.b32.xlu0 %v3322_v32, %s2188_s19  ;;  %v3573_v37 = vpop.permute.xlu1 %1591  ;;  %v1485_v55 = vadd.f32 %v4045_v43, %v1453_v61  ;;  %v844_v29 = vadd.f32 %v4046_v10, %v812_v11  ;;  %v871_v44 = vadd.f32 %v4047_v22, %v839_v14  ;;  %v4048_v5 = vld [vmem:[#allocation65_spill] sm:$0xff]  ;;  %v4049_v53 = vld [vmem:[#allocation66_spill] sm:$0xff]  ;;  %v4050_v35 = vld [vmem:[#allocation68_spill] sm:$0xff] }
 0x1df   : > { %4044 = vst [vmem:[#allocation10_spill] sm:$0xff] %v3573_v37  ;;  %v904_v34 = vadd.f32 %v4048_v5, %v872_v39  ;;  %v874_v12 = vadd.f32 %v4049_v53, %v842_v54  ;;  %v1135_v9 = vadd.f32 %v4050_v35, %v1103_v40  ;;  %v4051_v30 = vld [vmem:[#allocation67_spill] sm:$0xff]  ;;  %v4052_v38 = vld [vmem:[#allocation69_spill] sm:$0xff]  ;;  %v4054_v61 = vld [vmem:[#allocation70_spill] sm:$0xff] }
 0x1e0   : > { %v1165_v25 = vadd.f32 %v4051_v30, %v1133_v46  ;;  %v1426_v31 = vadd.f32 %v4052_v38, %v2822_v51  ;;  %v3584_v28 = vpop.permute.xlu0 %1563  ;;  %593 = vrot.lane.b32.xlu1 %v3305_v21, %s2188_s19  ;;  %v1195_v11 = vadd.f32 %v4054_v61, %v1163_v2  ;;  %v4055_v43 = vld [vmem:[#allocation72_spill] sm:$0xff]  ;;  %v4056_v10 = vld [vmem:[#allocation71_spill] sm:$0xff]  ;;  %v4057_v22 = vld [vmem:[#allocation73_spill] sm:$0xff] }
 0x1e1   : > { %4053 = vst [vmem:[#allocation22_spill] sm:$0xff] %v3584_v28  ;;  %v1456_v14 = vadd.f32 %v4055_v43, %v1424_v58  ;;  %v1483_v39 = vadd.f32 %v4056_v10, %v1451_v18  ;;  %v1516_v54 = vadd.f32 %v4057_v22, %v1484_v45  ;;  %v4058_v5 = vld [vmem:[#allocation74_spill] sm:$0xff]  ;;  %v4059_v53 = vld [vmem:[#allocation76_spill] sm:$0xff]  ;;  %v4060_v35 = vld [vmem:[#allocation75_spill] sm:$0xff] }
 0x1e2   : > { %v1486_v40 = vadd.f32 %v4058_v5, %v1454_v1  ;;  %v845_v46 = vadd.f32 %v4059_v53, %v813_v50  ;;  %v875_v30 = vadd.f32 %v4060_v35, %v843_v49  ;;  %v4061_v51 = vld [vmem:[#allocation77_spill] sm:$0xff]  ;;  %565 = vrot.lane.b32.xlu0 %v3344_v0, %s2187_s18  ;;  %v3598_v28 = vpop.permute.xlu1 %953  ;;  %v4062_v2 = vld [vmem:[#allocation78_spill] sm:$0xff]  ;;  %v4063_v58 = vld [vmem:[#allocation80_spill] sm:$0xff] }
 0x1e3   : > { %v1136_v38 = vadd.f32 %v4061_v51, %v1104_v6  ;;  %v905_v61 = vadd.f32 %v4062_v2, %v873_v3  ;;  %v1166_v43 = vadd.f32 %v4063_v58, %v1134_v19  ;;  %v4064_v18 = vld [vmem:[#allocation79_spill] sm:$0xff]  ;;  %v4065_v45 = vld [vmem:[#allocation89_spill] sm:$0xff]  ;;  %v4066_v1 = vld [vmem:[#allocation82_spill] sm:$0xff] }
 0x1e4   : > { %v1193_v10 = vadd.f32 %v4064_v18, %v1161_v57  ;;  %v936_v22 = vadd.f32 %v4065_v45, %v904_v34  ;;  %v1196_v5 = vadd.f32 %v4066_v1, %v1164_v13  ;;  %v4067_v50 = vld [vmem:[#allocation81_spill] sm:$0xff]  ;;  %v4068_v49 = vld [vmem:[#allocation84_spill] sm:$0xff]  ;;  %v4069_v6 = vld [vmem:[#allocation83_spill] sm:$0xff]  ;;  %v3608_v37 = vpop.permute.xlu0 %925  ;;  %567 = vrot.lane.b32.xlu1 %v3361_v63, %s2187_s18 }
 0x1e5   : > { %v1226_v53 = vadd.f32 %v4067_v50, %v1194_v48  ;;  %v1457_v35 = vadd.f32 %v4068_v49, %v1425_v62  ;;  %v1487_v51 = vadd.f32 %v4069_v6, %v1455_v7  ;;  %4070 = vst [vmem:[#allocation24_spill] sm:$0xff] %v3608_v37  ;;  %v4071_v3 = vld [vmem:[#allocation86_spill] sm:$0xff]  ;;  %v4072_v19 = vld [vmem:[#allocation85_spill] sm:$0xff]  ;;  %v4073_v57 = vld [vmem:[#allocation87_spill] sm:$0xff] }
 0x1e6   : > { %v1517_v2 = vadd.f32 %v4071_v3, %v1485_v55  ;;  %v846_v58 = vadd.f32 %v4072_v19, %v814_v56  ;;  %v903_v18 = vadd.f32 %v4073_v57, %v871_v44  ;;  %v968_v34 = vadd.f32 %v3287_v17, %v936_v22  ;;  %v4074_v13 = vld [vmem:[#allocation88_spill] sm:$0xff]  ;;  %v4075_v48 = vld [vmem:[#allocation90_spill] sm:$0xff]  ;;  %v4077_v7 = vld [vmem:[#allocation91_spill] sm:$0xff]  ;;  %539 = vrot.lane.b32.xlu0 %v3407_v59, %s2186_s17  ;;  %v3622_v6 = vpop.permute.xlu1 %1273 }
 0x1e7   : > { %v876_v45 = vadd.f32 %v4074_v13, %v844_v29  ;;  %v906_v1 = vadd.f32 %v4075_v48, %v874_v12  ;;  %v4076_v62 = vld [vmem:[#allocation92_spill] sm:$0xff]  ;;  %v1197_v49 = vadd.f32 %v4077_v7, %v1165_v25  ;;  %v4078_v55 = vld [vmem:[#allocation94_spill] sm:$0xff]  ;;  %v4079_v56 = vld [vmem:[#allocation93_spill] sm:$0xff] }
 0x1e8   : > { %v1167_v50 = vadd.f32 %v4076_v62, %v1135_v9  ;;  %v1227_v3 = vadd.f32 %v4078_v55, %v1195_v11  ;;  %v1458_v19 = vadd.f32 %v4079_v56, %v1426_v31  ;;  %v4080_v44 = vld [vmem:[#allocation96_spill] sm:$0xff]  ;;  %v4081_v17 = vld [vmem:[#allocation95_spill] sm:$0xff]  ;;  %v4082_v29 = vld [vmem:[#allocation98_spill] sm:$0xff]  ;;  %v3632_v37 = vpop.permute.xlu0 %1245  ;;  %595 = vrot.lane.b32.xlu1 %v3325_v16, %s2188_s19  ;;  %v976_v56 = vmul.f32 0.125, %v968_v34 }
 0x1e9   : > { %v1488_v57 = vadd.f32 %v4080_v44, %v1456_v14  ;;  %v1515_v22 = vadd.f32 %v4081_v17, %v1483_v39  ;;  %v1518_v12 = vadd.f32 %v4082_v29, %v1486_v40  ;;  %v4083_v13 = vld [vmem:[#allocation97_spill] sm:$0xff]  ;;  %v4084_v48 = vld [vmem:[#allocation102_spill] sm:$0xff]  ;;  %v4085_v62 = vld [vmem:[#allocation111_spill] sm:$0xff]  ;;  %v938_v39 = vadd.f32 %v3294_v33, %v906_v1 }
 0x1ea   : > { %v1548_v9 = vadd.f32 %v4083_v13, %v1516_v54  ;;  %v937_v25 = vadd.f32 %v4084_v48, %v905_v61  ;;  %v935_v7 = vadd.f32 %v4085_v62, %v903_v18  ;;  %v4086_v11 = vld [vmem:[#allocation100_spill] sm:$0xff]  ;;  %v4087_v55 = vld [vmem:[#allocation99_spill] sm:$0xff]  ;;  %v4088_v44 = vld [vmem:[#allocation101_spill] sm:$0xff]  ;;  %589 = vrot.lane.b32.xlu0 %v3338_v27, %s2188_s19  ;;  %v3645_v29 = vpop.permute.xlu1 %1565 }
 0x1eb   : > { %v877_v31 = vadd.f32 %v4086_v11, %v845_v46  ;;  %v907_v14 = vadd.f32 %v4087_v55, %v875_v30  ;;  %v1168_v40 = vadd.f32 %v4088_v44, %v1136_v38  ;;  %v4089_v17 = vld [vmem:[#allocation105_spill] sm:$0xff]  ;;  %v4090_v13 = vld [vmem:[#allocation104_spill] sm:$0xff]  ;;  %v4091_v48 = vld [vmem:[#allocation103_spill] sm:$0xff]  ;;  %v970_v38 = vadd.f32 %v3433_v26, %v938_v39 }
 0x1ec   : > { %v1258_v54 = vadd.f32 %v4089_v17, %v1226_v53  ;;  %v969_v61 = vadd.f32 %v3380_v4, %v937_v25  ;;  %v967_v18 = vadd.f32 %v3423_v60, %v935_v7  ;;  %v1198_v46 = vadd.f32 %v4090_v13, %v1166_v43  ;;  %v4092_v62 = vld [vmem:[#allocation106_spill] sm:$0xff]  ;;  %v4093_v34 = vld [vmem:[#allocation108_spill] sm:$0xff]  ;;  %v4094_v1 = vld [vmem:[#allocation107_spill] sm:$0xff]  ;;  %v3655_v11 = vpop.permute.xlu0 %1537  ;;  %569 = vrot.lane.b32.xlu1 %v3384_v42, %s2187_s18 }
 0x1ed   : > { %v1225_v30 = vadd.f32 %v4091_v48, %v1193_v10  ;;  %v1228_v33 = vadd.f32 %v4092_v62, %v1196_v5  ;;  %v1489_v53 = vadd.f32 %v4093_v34, %v1457_v35  ;;  %v1519_v4 = vadd.f32 %v4094_v1, %v1487_v51  ;;  %v4095_v25 = vld [vmem:[#allocation109_spill] sm:$0xff]  ;;  %v4096_v43 = vld [vmem:[#allocation110_spill] sm:$0xff]  ;;  %v4097_v5 = vld [vmem:[#allocation112_spill] sm:$0xff] }
 0x1ee   : > { %v878_v60 = vadd.f32 %v4095_v25, %v846_v58  ;;  %v1290_v7 = vadd.f32 %v3396_v20, %v1258_v54  ;;  %v1549_v10 = vadd.f32 %v4096_v43, %v1517_v2  ;;  %v908_v55 = vadd.f32 %v4097_v5, %v876_v45  ;;  %623 = vrot.lane.b32.xlu0 %v3322_v32, %s2189_s20  ;;  %v3666_v20 = vpop.permute.xlu1 %1593  ;;  %v4107_v1 = vld [vmem:[#allocation117_spill] sm:$0xff] }
 0x1ef   : > { %v1665_v44 = vrot.slane %v976_v56, 7  ;;  %v1259_v26 = vadd.f32 %v3327_v24, %v1227_v3  ;;  %v1199_v35 = vadd.f32 %v3308_v36, %v1167_v50  ;;  %v1229_v51 = vadd.f32 %v3302_v41, %v1197_v49  ;;  %v4098_v50 = vld [vmem:[#allocation8_spill] sm:$0xff]  ;;  %v4099_v56 = vld [vmem:[#allocation113_spill] sm:$0xff] }
 0x1f0   : > { %v977_v58 = vmul.f32 0.125, %v969_v61  ;;  %v975_v39 = vmul.f32 0.125, %v967_v18  ;;  %v1490_v17 = vadd.f32 %v3320_v52, %v1458_v19  ;;  %v939_v2 = vadd.f32 %v3365_v8, %v907_v14  ;;  %v1588_v3 = vpop.permute.xlu0 %1587  ;;  %625 = vrot.lane.b32.xlu1 %v3305_v21, %s2189_s20  ;;  %v4100_v18 = vld [vmem:[#allocation116_spill] sm:$0xff]  ;;  %v4101_v19 = vld [vmem:[#allocation118_spill] sm:$0xff] }
 0x1f1   : > { %v978_v54 = vmul.f32 0.125, %v970_v38  ;;  %v1291_v45 = vadd.f32 %v3439_v47, %v1259_v26  ;;  %v1520_v24 = vadd.f32 %v3340_v15, %v1488_v57  ;;  %v1547_v36 = vadd.f32 %v3336_v23, %v1515_v22  ;;  %v4102_v14 = vld [vmem:[#allocation18_spill] sm:$0xff]  ;;  %v4104_v57 = vld [vmem:[#allocation115_spill] sm:$0xff]  ;;  %v4110_v26 = vld [vmem:[#allocation120_spill] sm:$0xff] }
 0x1f2   : > { %v1580_v41 = vadd.f32 %v4098_v50, %v1548_v9  ;;  %v1298_v49 = vmul.f32 0.125, %v1290_v7  ;;  %v1550_v61 = vadd.f32 %v4099_v56, %v1518_v12  ;;  %v1257_v52 = vadd.f32 %v4100_v18, %v1225_v30  ;;  %v4103_v47 = vld [vmem:[#allocation114_spill] sm:$0xff]  ;;  %597 = vrot.lane.b32.xlu0 %v3344_v0, %s2188_s19  ;;  %v3685_v9 = vpop.permute.xlu1 %1247  ;;  %v4105_v30 = vld [vmem:[#allocation20_spill] sm:$0xff]  ;;  %v4108_v7 = vld [vmem:[#allocation119_spill] sm:$0xff] }
 0x1f3   : > { %v1260_v8 = vadd.f32 %v4101_v19, %v1228_v33  ;;  %v971_v13 = vadd.f32 %v4102_v14, %v939_v2  ;;  %v909_v48 = vadd.f32 %v4103_v47, %v877_v31  ;;  %v1667_v15 = vrot.slane %v977_v58, 6  ;;  %v4106_v33 = vld [vmem:[#allocation21_spill] sm:$0xff]  ;;  %v4113_v56 = vld [vmem:[#allocation123_spill] sm:$0xff] }
 0x1f4   : > { %v1200_v23 = vadd.f32 %v4104_v57, %v1168_v40  ;;  %v1666_v22 = vsel %vm1636_vm0, %v1665_v44, %v975_v39  ;;  %v1669_v12 = vrot.slane %v978_v54, 5  ;;  %v1299_v62 = vmul.f32 0.125, %v1291_v45  ;;  %v4109_v40 = vld [vmem:[#allocation131_spill] sm:$0xff]  ;;  %v956_v44 = vpop.permute.xlu0 %955  ;;  %599 = vrot.lane.b32.xlu1 %v3361_v63, %s2188_s19  ;;  %v4111_v39 = vld [vmem:[#allocation122_spill] sm:$0xff]  ;;  %v4112_v54 = vld [vmem:[#allocation121_spill] sm:$0xff] }
 0x1f5   : > { %v1289_v38 = vadd.f32 %v4105_v30, %v1257_v52  ;;  %v1292_v34 = vadd.f32 %v4106_v33, %v1260_v8  ;;  %v1230_v25 = vadd.f32 %v4107_v1, %v1198_v46  ;;  %v1690_v31 = vrot.slane %v1298_v49, 7  ;;  %v4114_v49 = vld [vmem:[#allocation124_spill] sm:$0xff]  ;;  %v4117_v47 = vld [vmem:[#allocation129_spill] sm:$0xff] }
 0x1f6   : > { %v1551_v43 = vadd.f32 %v4108_v7, %v1519_v4  ;;  %v1612_v5 = vadd.f32 %v4109_v40, %v1580_v41  ;;  %v1521_v58 = vadd.f32 %v4110_v26, %v1489_v53  ;;  %v1581_v2 = vadd.f32 %v4111_v39, %v1549_v10  ;;  %v4115_v4 = vld [vmem:[#allocation125_spill] sm:$0xff]  ;;  %571 = vrot.lane.b32.xlu0 %v3407_v59, %s2187_s18  ;;  %v3703_v41 = vpop.permute.xlu1 %1567  ;;  %v4122_v7 = vld [vmem:[#allocation130_spill] sm:$0xff]  ;;  %v4123_v40 = vld [vmem:[#allocation24_spill] sm:$0xff] }
 0x1f7   : > { %v910_v45 = vadd.f32 %v4112_v54, %v878_v60  ;;  %v979_v50 = vmul.f32 0.125, %v971_v13  ;;  %v940_v18 = vadd.f32 %v4113_v56, %v908_v55  ;;  %v1668_v46 = vsel %vm1639_vm1, %v1667_v15, %v1666_v22  ;;  %v4116_v60 = vld [vmem:[#allocation126_spill] sm:$0xff]  ;;  %v4119_v30 = vld [vmem:[#allocation9_spill] sm:$0xff]  ;;  %v4124_v54 = vld [vmem:[#allocation132_spill] sm:$0xff] }
 0x1f8   : > { %v1231_v52 = vadd.f32 %v4114_v49, %v1199_v35  ;;  %v1261_v19 = vadd.f32 %v4115_v4, %v1229_v51  ;;  %v1670_v53 = vsel %vm1642_vm2, %v1669_v12, %v1668_v46  ;;  %v1692_v8 = vrot.slane %v1299_v62, 6  ;;  %v4118_v15 = vld [vmem:[#allocation10_spill] sm:$0xff]  ;;  %v1276_v35 = vpop.permute.xlu0 %1275  ;;  %627 = vrot.lane.b32.xlu1 %v3325_v16, %s2189_s20  ;;  %v4120_v62 = vld [vmem:[#allocation127_spill] sm:$0xff] }
 0x1f9   : > { %v1297_v10 = vmul.f32 0.125, %v1289_v38  ;;  %v1300_v14 = vmul.f32 0.125, %v1292_v34  ;;  %v1552_v13 = vadd.f32 %v4116_v60, %v1520_v24  ;;  %v1579_v55 = vadd.f32 %v4117_v47, %v1547_v36  ;;  %v4121_v34 = vld [vmem:[#allocation128_spill] sm:$0xff]  ;;  %v4126_v4 = vld [vmem:[#allocation22_spill] sm:$0xff] }
 0x1fa   : > { %v1620_v57 = vmul.f32 0.125, %v1612_v5  ;;  %v1613_v22 = vadd.f32 %v4118_v15, %v1581_v2  ;;  %v1671_v51 = vrot.slane %v979_v50, 4  ;;  %v1262_v33 = vadd.f32 %v4119_v30, %v1230_v25  ;;  %621 = vrot.lane.b32.xlu0 %v3338_v27, %s2189_s20  ;;  %v958_v26 = vpop.permute.xlu1 %957  ;;  %v2109_v30 = vld [vmem:[%s3835_s3] sm:$0xff]  }
 0x1fb   : > { %v972_v1 = vadd.f32 %v3598_v28, %v940_v18  ;;  %v1293_v12 = vadd.f32 %v3622_v6, %v1261_v19  ;;  %v1522_v38 = vadd.f32 %v4120_v62, %v1490_v17  ;;  %v1582_v24 = vadd.f32 %v4121_v34, %v1550_v61 }
 0x1fc   : > { %v941_v36 = vadd.f32 %v4122_v7, %v909_v48  ;;  %v942_v5 = vadd.f32 %v4123_v40, %v910_v45  ;;  %v1691_v39 = vsel %vm1636_vm0, %v1690_v31, %v1297_v10  ;;  %v1694_v2 = vrot.slane %v1300_v14, 5  ;;  %v1596_v61 = vpop.permute.xlu0 %1595  ;;  %629 = vrot.lane.b32.xlu1 %v3344_v0, %s2189_s20 }
 0x1fd   : > { %v1611_v25 = vadd.f32 %v1588_v3, %v1579_v55  ;;  %v1294_v28 = vadd.f32 %v1276_v35, %v1262_v33  ;;  %v1232_v6 = vadd.f32 %v4124_v54, %v1200_v23  ;;  %v3722_v50 = vmul.f32 0.125, %v1613_v22  ;;  %v4125_v3 = vld [vmem:[#allocation19_spill] sm:$0xff] }
 0x1fe   : > { %v973_v17 = vadd.f32 %v956_v44, %v941_v36  ;;  %v974_v56 = vadd.f32 %v958_v26, %v942_v5  ;;  %v1715_v48 = vrot.slane %v1620_v57, 7  ;;  %v1672_v45 = vsel %vm1645_vm3, %v1671_v51, %v1670_v53  ;;  %601 = vrot.lane.b32.xlu0 %v3384_v42, %s2188_s19  ;;  %v1570_v44 = vpop.permute.xlu1 %1569 }
 0x1ff   : > { %v980_v18 = vmul.f32 0.125, %v972_v1  ;;  %v1301_v46 = vmul.f32 0.125, %v1293_v12  ;;  %v1693_v31 = vsel %vm1639_vm1, %v1692_v8, %v1691_v39  ;;  %v1553_v49 = vadd.f32 %v4125_v3, %v1521_v58  ;;  %v2111_v3 = vld [vmem:[%s3837_s5 + $0x8] sm:$0xff]  }
 0x200   : > { %v1583_v23 = vadd.f32 %v4126_v4, %v1551_v43  ;;  %v1614_v19 = vadd.f32 %v3666_v20, %v1582_v24  ;;  %v1695_v10 = vsel %vm1642_vm2, %v1694_v2, %v1693_v31  ;;  %v1263_v53 = vadd.f32 %v3632_v37, %v1231_v52  ;;  %v1278_v57 = vpop.permute.xlu0 %1277  ;;  %631 = vrot.lane.b32.xlu1 %v3361_v63, %s2189_s20 }
 0x201   : > { %v1619_v14 = vmul.f32 0.125, %v1611_v25  ;;  %v1302_v60 = vmul.f32 0.125, %v1294_v28  ;;  %v1717_v47 = vrot.slane %v3722_v50, 6  ;;  %v981_v8 = vmul.f32 0.125, %v973_v17  ;;  %v2110_v50 = vld [vmem:[%s3837_s5] sm:$0xff]  }
 0x202   : > { %v1615_v55 = vadd.f32 %v1596_v61, %v1583_v23  ;;  %v982_v58 = vmul.f32 0.125, %v974_v56  ;;  %v1673_v20 = vrot.slane %v980_v18, 3  ;;  %v1696_v43 = vrot.slane %v1301_v46, 4  ;;  %603 = vrot.lane.b32.xlu0 %v3407_v59, %s2188_s19  ;;  %v1280_v51 = vpop.permute.xlu1 %1279 }
 0x203   : > { %v1264_v15 = vadd.f32 %v3685_v9, %v1232_v6  ;;  %v1295_v22 = vadd.f32 %v1278_v57, %v1263_v53  ;;  %v1554_v35 = vadd.f32 %v3655_v11, %v1522_v38  ;;  %v1584_v37 = vadd.f32 %v3645_v29, %v1552_v13 }
 0x204   : > { %v1622_v52 = vmul.f32 0.125, %v1614_v19  ;;  %v1716_v33 = vsel %vm1636_vm0, %v1715_v48, %v1619_v14  ;;  %v1698_v1 = vrot.slane %v1302_v60, 3  ;;  %v2190_v9 = vmov 0.0   ;;  %v1598_v34 = vpop.permute.xlu0 %1597  ;;  %635 = vrot.lane.b32.xlu1 %v3407_v59, %s2189_s20  ;;  %v2112_v60 = vld [vmem:[%s3837_s5 + $0x10] sm:$0xff]  }
 0x205   : > { %v1303_v12 = vmul.f32 0.125, %v1295_v22  ;;  %v1296_v62 = vadd.f32 %v1280_v51, %v1264_v15  ;;  %2042 = vmatprep.subr.bf16.mxu0 %v2190_v9  ;;  %2048 = vmatprep.subr.bf16.mxu1 %v2190_v9  ;;  %v1675_v29 = vrot.slane %v981_v8, 2  ;;  %v1623_v11 = vmul.f32 0.125, %v1615_v55 }
 0x206   : > { %v1677_v13 = vrot.slane %v982_v58, 1  ;;  %v1586_v38 = vadd.f32 %v1570_v44, %v1554_v35  ;;  %2043 = vmatpush3.bf16.msra.mxu0 %v2109_v30  ;;  %v1616_v7 = vadd.f32 %v1598_v34, %v1584_v37  ;;  %v1674_v40 = vsel %vm1648_vm4, %v1673_v20, %v1672_v45  ;;  %633 = vrot.lane.b32.xlu0 %v3384_v42, %s2189_s20  ;;  %v1602_v2 = vpop.permute.xlu1 %1601  ;;  %v2113_v20 = vld [vmem:[%s3837_s5 + $0x18] sm:$0xff]   ;;  %v2114_v37 = vld [vmem:[%s3837_s5 + $0x20] sm:$0xff]  }
 0x207   : > { %v1700_v24 = vrot.slane %v1303_v12, 2  ;;  %v1304_v36 = vmul.f32 0.125, %v1296_v62  ;;  %v1697_v5 = vsel %vm1645_vm3, %v1696_v43, %v1695_v10  ;;  %v1719_v26 = vrot.slane %v1622_v52, 5  ;;  %2044 = vmatprep.mubr.msk.bf16.mxu0 %vm2191_vm7, %v2190_v9  ;;  %2064 = vmatprep.mubr.msk.bf16.mxu1 %vm2191_vm7, %v2190_v9 }
 0x208   : > { %v1585_v39 = vadd.f32 %v3703_v41, %v1553_v49  ;;  %v1699_v25 = vsel %vm1648_vm4, %v1698_v1, %v1697_v5  ;;  %v1624_v28 = vmul.f32 0.125, %v1616_v7  ;;  %v1618_v6 = vadd.f32 %v1602_v2, %v1586_v38  ;;  %v1600_v61 = vpop.permute.xlu0 %1599  ;;  %2049 = vmatpush3.bf16.msra.mxu1 %v2110_v50 }
 0x209   : > { %v1702_v54 = vrot.slane %v1304_v36, 1  ;;  %v1718_v41 = vsel %vm1639_vm1, %v1717_v47, %v1716_v33  ;;  %v1721_v17 = vrot.slane %v1623_v11, 4  ;;  %v1676_v56 = vsel %vm1651_vm5, %v1675_v29, %v1674_v40  ;;  %2050 = vmatprep.subr.bf16.mxu1 %v2190_v9 }
 0x20a   : > { %v1701_v48 = vsel %vm1651_vm5, %v1700_v24, %v1699_v25  ;;  %v1617_v45 = vadd.f32 %v1600_v61, %v1585_v39  ;;  %v1626_v18 = vmul.f32 0.125, %v1618_v6  ;;  %v1678_v46 = vsel %vm1654_vm6, %v1677_v13, %v1676_v56  ;;  %v434_v4 = vpop.permute.xlu1 %433 }
 0x20b   : > { %v1703_v31 = vsel %vm1654_vm6, %v1702_v54, %v1701_v48  ;;  %v1723_v49 = vrot.slane %v1624_v28, 3  ;;  %1679 = vrot.lane.b32.xlu0 %v1678_v46, %s2192_s11  ;;  %v1720_v19 = vsel %vm1642_vm2, %v1719_v26, %v1718_v41  ;;  %v455_v51 = vadd.f32 %v434_v4, %v3305_v21 }
 0x20c   : > { %1704 = vrot.lane.b32.xlu1 %v1703_v31, %s2193_s12  ;;  %v1625_v23 = vmul.f32 0.125, %v1617_v45  ;;  %v1727_v44 = vrot.slane %v1626_v18, 1  ;;  %v432_v10 = vpop.permute.xlu0 %431  ;;  %v1722_v53 = vsel %vm1645_vm3, %v1721_v17, %v1720_v19  ;;  %2051 = vmatpush3.bf16.msra.mxu1 %v2111_v3  ;;  %s305_s12 = scalar_lea.vmem %s3839_s7, %s1998_s30 }
 0x20d   : > { %v1724_v47 = vsel %vm1648_vm4, %v1723_v49, %v1722_v53  ;;  %2052 = vmatprep.subr.bf16.mxu1 %v2190_v9  ;;  %v454_v15 = vadd.f32 %v432_v10, %v3322_v32  ;;  %v2115_v32 = vld [vmem:[%s3837_s5 + $0x28] sm:$0xff]  }
 0x20e   : > { %v1725_v14 = vrot.slane %v1625_v23, 2  ;;  %v436_v8 = vpop.permute.xlu1 %435 }
 0x20f   : > { %v456_v33 = vadd.f32 %v436_v8, %v3325_v16 }
 0x210   : > { %v1726_v55 = vsel %vm1651_vm5, %v1725_v14, %v1724_v47  ;;  %v430_v58 = vpop.permute.xlu0 %429  ;;  %2053 = vmatpush3.bf16.msra.mxu1 %v2112_v60 }
 0x211   : > { %v1728_v57 = vsel %vm1654_vm6, %v1727_v44, %v1726_v55  ;;  %2054 = vmatprep.subr.bf16.mxu1 %v2190_v9  ;;  %v453_v62 = vadd.f32 %v430_v58, %v3338_v27 }
 0x212   : > { %1729 = vrot.lane.b32.xlu0 %v1728_v57, %s2194_s15  ;;  %v438_v43 = vpop.permute.xlu1 %437 }
 0x213   : > { %v457_v24 = vadd.f32 %v438_v43, %v3344_v0 }
 0x214   : > { %v464_v22 = vpop.permute.xlu0 %463  ;;  %2055 = vmatpush3.bf16.msra.mxu1 %v2113_v20 }
 0x215   : > { %v486_v35 = vadd.f32 %v464_v22, %v454_v15  ;;  %2056 = vmatprep.subr.bf16.mxu1 %v2190_v9 }
 0x216   : > { %v440_v52 = vpop.permute.xlu1 %439 }
 0x217   : > { %v458_v40 = vadd.f32 %v440_v52, %v3361_v63 }
 0x218   : > { %v466_v30 = vpop.permute.xlu0 %465  ;;  %2057 = vmatpush3.bf16.msra.mxu1 %v2114_v37 }
 0x219   : > { %v487_v1 = vadd.f32 %v466_v30, %v455_v51  ;;  %2058 = vmatprep.subr.bf16.mxu1 %v2190_v9 }
 0x21a   : > { %v468_v12 = vpop.permute.xlu1 %467 }
 0x21b   : > { %v488_v29 = vadd.f32 %v468_v12, %v456_v33 }
 0x21c   : > { %v462_v11 = vpop.permute.xlu0 %461  ;;  %2059 = vmatpush3.bf16.msra.mxu1 %v2115_v32 }
 0x21d   : > { %v485_v13 = vadd.f32 %v462_v11, %v453_v62  ;;  %2060 = vmatprep.subr.bf16.mxu1 %v2190_v9 }
 0x21e   : > { %v3796_v38 = vpop.permute.xlu1 %441 }
 0x220   : > { %v496_v21 = vpop.permute.xlu0 %495 }
 0x221   : > { %v518_v16 = vadd.f32 %v496_v21, %v486_v35 }
 0x222   : > { %v498_v34 = vpop.permute.xlu1 %497 }
 0x223   : > { %v519_v7 = vadd.f32 %v498_v34, %v487_v1 }
 0x224   : > { %v470_v36 = vpop.permute.xlu0 %469 }
 0x225   : > { %v489_v5 = vadd.f32 %v470_v36, %v457_v24 }
 0x226   : > { %v472_v26 = vpop.permute.xlu1 %471 }
 0x227   : > { %v490_v27 = vadd.f32 %v472_v26, %v458_v40  ;;  %v459_v26 = vadd.f32 %v3796_v38, %v3384_v42 }
 0x228   : > { %v444_v39 = vpop.permute.xlu0 %443 }
 0x229   : > { %v460_v21 = vadd.f32 %v444_v39, %v3407_v59 }
 0x22a   : > { %v500_v2 = vpop.permute.xlu1 %499 }
 0x22b   : > { %v520_v25 = vadd.f32 %v500_v2, %v488_v29 }
 0x22c   : > { %v494_v28 = vpop.permute.xlu0 %493 }
 0x22d   : > { %v517_v54 = vadd.f32 %v494_v28, %v485_v13 }
 0x22e   : > { %v474_v6 = vpop.permute.xlu1 %473 }
 0x230   : > { %v528_v50 = vpop.permute.xlu0 %527 }
 0x231   : > { %v550_v58 = vadd.f32 %v528_v50, %v518_v16 }
 0x232   : > { %v530_v41 = vpop.permute.xlu1 %529 }
 0x233   : > { %v551_v57 = vadd.f32 %v530_v41, %v519_v7 }
 0x234   : > { %v502_v17 = vpop.permute.xlu0 %501 }
 0x235   : > { %v521_v30 = vadd.f32 %v502_v17, %v489_v5  ;;  %v491_v17 = vadd.f32 %v474_v6, %v459_v26 }
 0x236   : > { %v504_v61 = vpop.permute.xlu1 %503 }
 0x237   : > { %v522_v16 = vadd.f32 %v504_v61, %v490_v27 }
 0x238   : > { %v476_v56 = vpop.permute.xlu0 %475 }
 0x239   : > { %v492_v5 = vadd.f32 %v476_v56, %v460_v21  ;;  %v2117_v21 = vld [vmem:[%s3837_s5 + $0x38] sm:$0xff]  }
 0x23a   : > { %v532_v48 = vpop.permute.xlu1 %531 }
 0x23b   : > { %v552_v35 = vadd.f32 %v532_v48, %v520_v25 }
 0x23c   : > { %v526_v0 = vpop.permute.xlu0 %525 }
 0x23d   : > { %v549_v33 = vadd.f32 %v526_v0, %v517_v54 }
 0x23e   : > { %v506_v45 = vpop.permute.xlu1 %505 }
 0x240   : > { %v560_v18 = vpop.permute.xlu0 %559 }
 0x241   : > { %v582_v43 = vadd.f32 %v560_v18, %v550_v58 }
 0x242   : > { %v562_v46 = vpop.permute.xlu1 %561 }
 0x243   : > { %v583_v15 = vadd.f32 %v562_v46, %v551_v57  ;;  %v523_v46 = vadd.f32 %v506_v45, %v491_v17 }
 0x244   : > { %v534_v63 = vpop.permute.xlu0 %533 }
 0x245   : > { %v553_v29 = vadd.f32 %v534_v63, %v521_v30 }
 0x246   : > { %v536_v31 = vpop.permute.xlu1 %535 }
 0x247   : > { %v554_v2 = vadd.f32 %v536_v31, %v522_v16  ;;  %v2017_v16 = vld [vmem:[%s3836_s4] ss:$0 sm:$0xff] }
 0x248   : > { %v508_v3 = vpop.permute.xlu0 %507 }
 0x249   : > { %v524_v48 = vadd.f32 %v508_v3, %v492_v5 }
 0x24a   : > { %v564_v49 = vpop.permute.xlu1 %563 }
 0x24b   : > { %v584_v1 = vadd.f32 %v564_v49, %v552_v35 }
 0x24c   : > { %v558_v4 = vpop.permute.xlu0 %557 }
 0x24d   : > { %v581_v11 = vadd.f32 %v558_v4, %v549_v33 }
 0x24e   : > { %v538_v23 = vpop.permute.xlu1 %537 }
 0x24f   : > { %v555_v31 = vadd.f32 %v538_v23, %v523_v46 }
 0x250   : > { %v592_v19 = vpop.permute.xlu0 %591 }
 0x251   : > { %v614_v37 = vadd.f32 %v592_v19, %v582_v43 }
 0x252   : > { %v594_v44 = vpop.permute.xlu1 %593 }
 0x253   : > { %v615_v52 = vadd.f32 %v594_v44, %v583_v15 }
 0x254   : > { %v566_v10 = vpop.permute.xlu0 %565 }
 0x255   : > { %v585_v24 = vadd.f32 %v566_v10, %v553_v29 }
 0x256   : > { %v568_v53 = vpop.permute.xlu1 %567 }
 0x257   : > { %v586_v0 = vadd.f32 %v568_v53, %v554_v2 }
 0x258   : > { %v540_v14 = vpop.permute.xlu0 %539 }
 0x259   : > { %v556_v4 = vadd.f32 %v540_v14, %v524_v48 }
 0x25a   : > { %v596_v60 = vpop.permute.xlu1 %595 }
 0x25b   : > { %v616_v13 = vadd.f32 %v596_v60, %v584_v1 }
 0x25c   : > { %v590_v47 = vpop.permute.xlu0 %589 }
 0x25d   : > { %v613_v7 = vadd.f32 %v590_v47, %v581_v11 }
 0x25e   : > { %v570_v8 = vpop.permute.xlu1 %569 }
 0x25f   : > { %v587_v47 = vadd.f32 %v570_v8, %v555_v31 }
 0x260   : > { %v624_v55 = vpop.permute.xlu0 %623 }
 0x261   : > { %v646_v32 = vadd.f32 %v624_v55, %v614_v37 }
 0x262   : > { %v626_v20 = vpop.permute.xlu1 %625 }
 0x263   : > { %v647_v12 = vadd.f32 %v626_v20, %v615_v52  ;;  %v654_v36 = vmul.f32 0.125, %v646_v32 }
 0x264   : > { %v598_v22 = vpop.permute.xlu0 %597 }
 0x265   : > { %v655_v25 = vmul.f32 0.125, %v647_v12  ;;  %v617_v54 = vadd.f32 %v598_v22, %v585_v24  ;;  %v1635_v27 = vrot.slane %v654_v36, 7 }
 0x266   : > { %v600_v51 = vpop.permute.xlu1 %599 }
 0x267   : > { %v1638_v63 = vrot.slane %v655_v25, 6  ;;  %v618_v42 = vadd.f32 %v600_v51, %v586_v0 }
 0x268   : > { %v572_v62 = vpop.permute.xlu0 %571 }
 0x269   : > { %v588_v6 = vadd.f32 %v572_v62, %v556_v4 }
 0x26a   : > { %v628_v34 = vpop.permute.xlu1 %627 }
 0x26b   : > { %v648_v40 = vadd.f32 %v628_v34, %v616_v13  ;;  %v2116_v13 = vld [vmem:[%s3837_s5 + $0x30] sm:$0xff]  }
 0x26c   : > { %v622_v28 = vpop.permute.xlu0 %621  ;;  %2061 = vmatpush3.bf16.msra.mxu1 %v2116_v13 }
 0x26d   : > { %v656_v50 = vmul.f32 0.125, %v648_v40  ;;  %v645_v41 = vadd.f32 %v622_v28, %v613_v7  ;;  %2062 = vmatprep.subr.bf16.mxu1 %v2190_v9  ;;  %v2020_v9 = vld [vmem:[%s3838_s6] ss:$0 sm:$0xff] }
 0x26e   : > { %v630_v59 = vpop.permute.xlu1 %629 }
 0x26f   : > { %v1641_v39 = vrot.slane %v656_v50, 5  ;;  %v653_v61 = vmul.f32 0.125, %v645_v41  ;;  %v649_v18 = vadd.f32 %v630_v59, %v617_v54 }
 0x270   : > { %v602_v49 = vpop.permute.xlu0 %601  ;;  %2063 = vmatpush3.bf16.msra.mxu1 %v2117_v21 }
 0x271   : > { %v1637_v38 = vsel %vm1636_vm0, %v1635_v27, %v653_v61  ;;  %v657_v56 = vmul.f32 0.125, %v649_v18  ;;  %v619_v57 = vadd.f32 %v602_v49, %v587_v47 }
 0x272   : > { %v1640_v19 = vsel %vm1639_vm1, %v1638_v63, %v1637_v38  ;;  %v632_v44 = vpop.permute.xlu1 %631 }
 0x273   : > { %v1643_v3 = vsel %vm1642_vm2, %v1641_v39, %v1640_v19  ;;  %v1644_v10 = vrot.slane %v657_v56, 4  ;;  %v650_v53 = vadd.f32 %v632_v44, %v618_v42 }
 0x274   : > { %v604_v60 = vpop.permute.xlu0 %603 }
 0x275   : > { %v1646_v45 = vsel %vm1645_vm3, %v1644_v10, %v1643_v3  ;;  %v658_v55 = vmul.f32 0.125, %v650_v53  ;;  %v620_v58 = vadd.f32 %v604_v60, %v588_v6 }
 0x276   : > { %v636_v14 = vpop.permute.xlu1 %635 }
 0x277   : > { %v1647_v20 = vrot.slane %v658_v55, 3  ;;  %v652_v43 = vadd.f32 %v636_v14, %v620_v58 }
 0x278   : > { %v634_v15 = vpop.permute.xlu0 %633 }
 0x279   : > { %v1649_v23 = vsel %vm1648_vm4, %v1647_v20, %v1646_v45  ;;  %v660_v22 = vmul.f32 0.125, %v652_v43  ;;  %v651_v35 = vadd.f32 %v634_v15, %v619_v57 }
 0x27b   : > { %v659_v37 = vmul.f32 0.125, %v651_v35  ;;  %v1653_v52 = vrot.slane %v660_v22, 1 }
 0x27d   : > { %v1650_v51 = vrot.slane %v659_v37, 2  ;;  %v1680_v8 = vpop.permute.xlu0 %1679 }
 0x27e   : > { %v1705_v32 = vpop.permute.xlu1 %1704 }
 0x27f   : > { %v1652_v30 = vsel %vm1651_vm5, %v1650_v51, %v1649_v23 }
 0x280   : > { %v1655_v33 = vsel %vm1654_vm6, %v1653_v52, %v1652_v30 }
 0x281   : > { %v1733_v1 = vsel %vm1732_vm8, %v1655_v33, %v1680_v8 }
 0x282   : > { %v1735_v12 = vsel %vm1734_vm9, %v1733_v1, %v1705_v32 }
 0x284   : > { %v1730_v62 = vpop.permute.xlu0 %1729 }
 0x285   : > { %v1737_v29 = vsel %vm1736_vm10, %v1735_v12, %v1730_v62 }
 0x286   : > { %v1738_v11 = vpack.c.bf16 %v1737_v29, %v1737_v29 }
 0x288   : > { %2045 = vmatmul.mubr.msk.bf16.vlgmr.msra.gmra.mrb[0].mxu0 %vm1754_vm11, %v1738_v11 }
 0x35b   : > { %v1792_v34 = vpop.f32.mrb[0].mxu0 }
 0x35c   : > { %v1793_v24 = vadd.f32 %v2017_v16, %v1792_v34  ;;  %v2046_v7 = vpop.f32.mrb[1].mxu0 }
 0x35d   : > { %v1795_v36 = vpop.f32.mrb[2].mxu0 }
 0x35e   : > { %v1798_v40 = vmax.f32 %v1793_v24, 0.0  ;;  %v2047_v26 = vpop.f32.mrb[3].mxu0 }
 0x360   : > { %v1799_v5 = vpack.c.bf16 %v1798_v40, %v1798_v40 }
 0x362   : > { %2065 = vmatmul.mubr.bf16.vlgmr.msra.gmra.mrb[0].mxu1 %v1799_v5 }
 0x435   : > { %v1905_v2 = vpop.f32.mrb[0].mxu1 }
 0x436   : > { %v1906_v25 = vadd.f32 %v2020_v9, %v1905_v2  ;;  %v2066_v28 = vpop.f32.mrb[1].mxu1 }
 0x437   : > { %v1908_v54 = vpop.f32.mrb[2].mxu1 }
 0x438   : > { %1911 = vst [vmem:[%s305_s12] sm:$0xff] %v1906_v25  ;;  %v2067_v50 = vpop.f32.mrb[3].mxu1 }
 0x439 PF: > { %s19_s24 = sadd.s32 1, %s2179_s24  }
 0x43a   : > { %p16_p12 = scmp.ge.s32.totalorder %s19_s24, 4  }
 0x43c   :  { %18 = sbr.rel (!%p16_p12) target bundleno = 2 (0x2), region = 87 }
 0x443   :  { %1931 = vsyncpa [#allocation3], 1 }
 0x444   :  { %1933 = vsyncpa [#allocation3 + $0x1], 1 }
 0x445   :  { %1934 = vsyncpa [#allocation5], 1 }

</bundles_post_ra>
